<compile_context>
chip_gen: v7x
topology: tpu7x:2x2x1
jax: 0.10.0
libtpu: 0.0.40
codegen_flags: <defaults>
</compile_context>

<pallas_src>
import jax
import jax.numpy as jnp
from jax.experimental import pallas as pl
from jax.experimental.pallas import tpu as pltpu

LN_EPS = 1e-5
H1, H2 = 512, 256


def _round_up(a, m):
    return ((a + m - 1) // m) * m


def _device_kind():
    try:
        return jax.devices()[0].device_kind.lower()
    except Exception:
        return ""


def _layer_norm_fused(h, gamma, beta, n_true):
    """Single-pass LayerNorm over the lane axis: var = E[x^2] - mu^2.

    `n_true` is the true feature count; any padded lanes must be exactly zero
    (guaranteed by the wrapper's zero padding), so the sums are unaffected.
    """
    inv_n = 1.0 / n_true
    s1 = jnp.sum(h, axis=-1, keepdims=True)
    s2 = jnp.sum(h * h, axis=-1, keepdims=True)
    mu = s1 * inv_n
    var = jnp.maximum(s2 * inv_n - mu * mu, 0.0)
    inv = jax.lax.rsqrt(var + LN_EPS)
    return (h - mu) * inv * gamma + beta


def neuromodulator_forward(x, params, *, matmul_dtype=jnp.bfloat16):
    """x: (B, total_dim) float32.  Returns (num_units,) float32.

    matmul_dtype=jnp.bfloat16 (default) runs the three matmuls on the MXU in
    bf16 with f32 accumulation (the fast path on v5e/v6e/v7x).  Use
    matmul_dtype=jnp.float32 for bit-accurate numerics (~1e-4 vs reference).
    """
    (w1, b1, g1, be1, w2, b2, g2, be2, w3, b3, g3, be3) = params
    B, total_dim = x.shape
    num_units = w3.shape[1]

    md = jnp.dtype(matmul_dtype)
    itemsize = md.itemsize
    gran = 16 if md == jnp.dtype(jnp.bfloat16) else 8

    # ---- lane-dense padding of the fc3 / output path (num_units -> mult of 128)
    nu_pad = _round_up(num_units, 128)
    if nu_pad != num_units:
        p = nu_pad - num_units
        w3 = jnp.pad(w3, ((0, 0), (0, p)))
        b3 = jnp.pad(b3, ((0, p),))
        g3 = jnp.pad(g3, ((0, p),))     # 0-padded gamma keeps padded lanes exactly 0
        be3 = jnp.pad(be3, ((0, p),))

    # ---- lane-dense padding of the input feature dim (fc1 K axis) ----
    td_pad = _round_up(total_dim, 128)
    if td_pad != total_dim:
        p = td_pad - total_dim
        x = jnp.pad(x, ((0, 0), (0, p)))
        w1 = jnp.pad(w1, ((0, p), (0, 0)))

    # MXU operands cast once in the wrapper (halves the streamed x bytes in bf16).
    xs = x.astype(matmul_dtype)
    w1c = w1.astype(matmul_dtype)
    w2c = w2.astype(matmul_dtype)
    w3c = w3.astype(matmul_dtype)

    weight_bytes = itemsize * (td_pad * H1 + H1 * H2 + H2 * nu_pad)

    kind = _device_kind()
    is_v7x = "v7" in kind
    vmem_cap = (48 << 20) if is_v7x else (100 << 20)

    # 2-way TensorCore split only on v7x, and only when per-core streamed
    # activation bytes clearly exceed the duplicated resident-weight bytes.
    core_splits = 2 if (is_v7x and B * td_pad * itemsize > 4 * weight_bytes) else 1

    # ---- batch tile derived from the VMEM budget ----
    per_row_bytes = 2 * td_pad * itemsize + 6 * (H1 + H2 + nu_pad) * 4
    budget = max(vmem_cap - weight_bytes - (12 << 20), per_row_bytes * gran)
    tb_budget = max(gran, (budget // per_row_bytes) // gran * gran)
    tb = min(512, tb_budget, _round_up(pl.cdiv(B, core_splits), gran))
    tiles_per_core = pl.cdiv(B, core_splits * tb)
    b_pad = core_splits * tiles_per_core * tb
    if b_pad != B:
        xs = jnp.pad(xs, ((0, b_pad - B), (0, 0)))

    def kernel(x_ref,
               w1_ref, b1_ref, g1_ref, be1_ref,
               w2_ref, b2_ref, g2_ref, be2_ref,
               w3_ref, b3_ref, g3_ref, be3_ref,
               out_ref):
        c = pl.program_id(0)
        i = pl.program_id(1)

        @pl.when(i == 0)
        def _():
            out_ref[...] = jnp.zeros_like(out_ref)

        xt = x_ref[...]

        # ---- fc1 -> LayerNorm(512) -> ReLU ----
        h = jnp.dot(xt, w1_ref[...], preferred_element_type=jnp.float32) + b1_ref[...]
        h = _layer_norm_fused(h, g1_ref[...], be1_ref[...], float(H1))
        h = jnp.maximum(h, 0.0)

        # ---- fc2 -> LayerNorm(256) -> ReLU ----
        h = jnp.dot(h.astype(w2_ref.dtype), w2_ref[...],
                    preferred_element_type=jnp.float32) + b2_ref[...]
        h = _layer_norm_fused(h, g2_ref[...], be2_ref[...], float(H2))
        h = jnp.maximum(h, 0.0)

        # ---- fc3 -> LayerNorm(num_units, lane-padded) -> Tanh ----
        h = jnp.dot(h.astype(w3_ref.dtype), w3_ref[...],
                    preferred_element_type=jnp.float32) + b3_ref[...]
        h = _layer_norm_fused(h, g3_ref[...], be3_ref[...], float(num_units))
        d = jnp.tanh(h)

        # ---- running batch sum directly in the resident output block ----
        if b_pad == B:
            out_ref[...] += jnp.sum(d, axis=0, keepdims=True).reshape(1, 1, nu_pad)
        else:
            tile_start = (c * tiles_per_core + i) * tb

            @pl.when(tile_start + tb <= B)      # full tile: no mask work
            def _():
                out_ref[...] += jnp.sum(d, axis=0, keepdims=True).reshape(1, 1, nu_pad)

            @pl.when(tile_start + tb > B)       # only the tile crossing row B-1
            def _():
                rows = tile_start + jax.lax.broadcasted_iota(jnp.int32, (tb, 1), 0)
                dm = jnp.where(rows < B, d, 0.0)
                out_ref[...] += jnp.sum(dm, axis=0, keepdims=True).reshape(1, 1, nu_pad)

        @pl.when(i == pl.num_programs(1) - 1)
        def _():
            out_ref[...] = out_ref[...] * (1.0 / B)

    const = lambda c, i: (0, 0)

    def build_in_specs(single_buffer):
        kw = dict(pipeline_mode=pl.Buffered(1)) if single_buffer else {}

        def param_spec(shape):
            return pl.BlockSpec(shape, const, **kw)

        return [
            pl.BlockSpec((tb, td_pad), lambda c, i: (c * tiles_per_core + i, 0)),
            param_spec((td_pad, H1)), param_spec((1, H1)),
            param_spec((1, H1)), param_spec((1, H1)),
            param_spec((H1, H2)), param_spec((1, H2)),
            param_spec((1, H2)), param_spec((1, H2)),
            param_spec((H2, nu_pad)), param_spec((1, nu_pad)),
            param_spec((1, nu_pad)), param_spec((1, nu_pad)),
        ]

    # Advisory cost estimate for XLA's scheduler.
    mm_flops = 2 * b_pad * (td_pad * H1 + H1 * H2 + H2 * nu_pad)
    cost = pl.CostEstimate(
        flops=mm_flops + 10 * b_pad * (H1 + H2 + nu_pad),
        transcendentals=b_pad * (nu_pad + 6),
        bytes_accessed=(xs.size * xs.dtype.itemsize
                        + weight_bytes
                        + 4 * 3 * (H1 + H2 + nu_pad)
                        + 4 * core_splits * nu_pad),
    )

    def run(single_buffer):
        wbuf = 1 if single_buffer else 2
        vmem_bytes = (wbuf * weight_bytes
                      + wbuf * 4 * 3 * (H1 + H2 + nu_pad)
                      + 2 * tb * td_pad * itemsize
                      + 6 * tb * (H1 + H2 + nu_pad) * 4
                      + 2 * nu_pad * 4
                      + (10 << 20))
        compiler_params = pltpu.CompilerParams(
            dimension_semantics=("parallel", "arbitrary"),
            vmem_limit_bytes=int(min(max(vmem_bytes, 16 << 20), vmem_cap)),
        )
        grid_spec = pltpu.PrefetchScalarGridSpec(
            num_scalar_prefetch=0,
            grid=(core_splits, tiles_per_core),
            in_specs=build_in_specs(single_buffer),
            out_specs=pl.BlockSpec((1, 1, nu_pad), lambda c, i: (c, 0, 0)),
        )
        return pl.pallas_call(
            kernel,
            out_shape=jax.ShapeDtypeStruct((core_splits, 1, nu_pad), jnp.float32),
            grid_spec=grid_spec,
            compiler_params=compiler_params,
            cost_estimate=cost,
        )(xs,
          w1c, b1.reshape(1, -1), g1.reshape(1, -1), be1.reshape(1, -1),
          w2c, b2.reshape(1, -1), g2.reshape(1, -1), be2.reshape(1, -1),
          w3c, b3.reshape(1, -1), g3.reshape(1, -1), be3.reshape(1, -1))

    try:
        out = run(single_buffer=True)
    except Exception:
        # Fallback if this JAX build rejects pl.Buffered(1) on constant operands.
        out = run(single_buffer=False)

    # Per-core partials (each already divided by the true B) -> full batch mean.
    return out.reshape(core_splits, nu_pad).sum(axis=0)[:num_units]


def init_params(key, total_dim, num_units):
    """Deterministic synthetic parameters (PyTorch Linear layout: (out, in),
    pre-transposed here to (in, out))."""
    ks = jax.random.split(key, 6)

    def linear(kw, kb, fan_in, fan_out):
        bound = 1.0 / jnp.sqrt(fan_in)
        w = jax.random.uniform(kw, (fan_out, fan_in), jnp.float32, -bound, bound)
        b = jax.random.uniform(kb, (fan_out,), jnp.float32, -bound, bound)
        return w.T, b  # (in, out), (out,)

    w1, b1 = linear(ks[0], ks[1], total_dim, H1)
    w2, b2 = linear(ks[2], ks[3], H1, H2)
    w3, b3 = linear(ks[4], ks[5], H2, num_units)

    # LayerNorm affine params (torch default init: gamma=1, beta=0).
    g1, be1 = jnp.ones((H1,), jnp.float32), jnp.zeros((H1,), jnp.float32)
    g2, be2 = jnp.ones((H2,), jnp.float32), jnp.zeros((H2,), jnp.float32)
    g3, be3 = jnp.ones((num_units,), jnp.float32), jnp.zeros((num_units,), jnp.float32)

    return (w1, b1, g1, be1, w2, b2, g2, be2, w3, b3, g3, be3)


def reference_forward(x, params):
    (w1, b1, g1, be1, w2, b2, g2, be2, w3, b3, g3, be3) = params

    def ln(h, g, b):
        mu = jnp.mean(h, axis=-1, keepdims=True)
        var = jnp.mean((h - mu) ** 2, axis=-1, keepdims=True)
        return (h - mu) / jnp.sqrt(var + LN_EPS) * g + b

    h1 = jax.nn.relu(ln(x @ w1 + b1, g1, be1))
    h2 = jax.nn.relu(ln(h1 @ w2 + b2, g2, be2))
    d = jnp.tanh(ln(h2 @ w3 + b3, g3, be3))
    return jnp.mean(d, axis=0)


if __name__ == "__main__":
    B, TOTAL_DIM, NUM_UNITS = 8, 32, 16

    key = jax.random.PRNGKey(0)
    kx, kp = jax.random.split(key)
    x = jax.random.normal(kx, (B, TOTAL_DIM), dtype=jnp.float32)
    params = init_params(kp, TOTAL_DIM, NUM_UNITS)

    ref = reference_forward(x, params)

    # f32 MXU path: bit-accurate correctness check.
    out_f32 = jax.block_until_ready(
        neuromodulator_forward(x, params, matmul_dtype=jnp.float32))
    assert out_f32.shape == (NUM_UNITS,)
    assert jnp.allclose(out_f32, ref, atol=1e-4, rtol=1e-4), (out_f32, ref)

    # Default bf16-MXU perf path: looser tolerance (bf16 operand rounding).
    out_bf16 = jax.block_until_ready(neuromodulator_forward(x, params))
    assert out_bf16.shape == (NUM_UNITS,)
    assert jnp.allclose(out_bf16, ref, atol=5e-2, rtol=5e-2), (out_bf16, ref)

    print("KERNEL_OK")
</pallas_src>

<mosaic_0001>
module attributes {stable_mosaic.version = 11 : i64} {
  func.func @kernel(%arg0: i32, %arg1: i32, %arg2: memref<8x128xf32, #tpu.memory_space<vmem>>, %arg3: memref<128x512xf32, #tpu.memory_space<vmem>>, %arg4: memref<1x512xf32, #tpu.memory_space<vmem>>, %arg5: memref<1x512xf32, #tpu.memory_space<vmem>>, %arg6: memref<1x512xf32, #tpu.memory_space<vmem>>, %arg7: memref<512x256xf32, #tpu.memory_space<vmem>>, %arg8: memref<1x256xf32, #tpu.memory_space<vmem>>, %arg9: memref<1x256xf32, #tpu.memory_space<vmem>>, %arg10: memref<1x256xf32, #tpu.memory_space<vmem>>, %arg11: memref<256x128xf32, #tpu.memory_space<vmem>>, %arg12: memref<1x128xf32, #tpu.memory_space<vmem>>, %arg13: memref<1x128xf32, #tpu.memory_space<vmem>>, %arg14: memref<1x128xf32, #tpu.memory_space<vmem>>, %arg15: memref<1x1x128xf32, #tpu.memory_space<vmem>>) attributes {dimension_semantics = [#tpu.dimension_semantics<parallel>, #tpu.dimension_semantics<arbitrary>], iteration_bounds = array<i64: 1, 1>, scalar_prefetch = 0 : i64, scratch_operands = 0 : i64, tpu.core_type = #tpu.core_type<tc>, window_params = [{transform_indices = @transform_0, window_bounds = array<i64: 8, 128>}, {pipeline_mode = #tpu.pipeline_mode<synchronous>, transform_indices = @transform_1, window_bounds = array<i64: 128, 512>}, {pipeline_mode = #tpu.pipeline_mode<synchronous>, transform_indices = @transform_2, window_bounds = array<i64: 1, 512>}, {pipeline_mode = #tpu.pipeline_mode<synchronous>, transform_indices = @transform_3, window_bounds = array<i64: 1, 512>}, {pipeline_mode = #tpu.pipeline_mode<synchronous>, transform_indices = @transform_4, window_bounds = array<i64: 1, 512>}, {pipeline_mode = #tpu.pipeline_mode<synchronous>, transform_indices = @transform_5, window_bounds = array<i64: 512, 256>}, {pipeline_mode = #tpu.pipeline_mode<synchronous>, transform_indices = @transform_6, window_bounds = array<i64: 1, 256>}, {pipeline_mode = #tpu.pipeline_mode<synchronous>, transform_indices = @transform_7, window_bounds = array<i64: 1, 256>}, {pipeline_mode = #tpu.pipeline_mode<synchronous>, transform_indices = @transform_8, window_bounds = array<i64: 1, 256>}, {pipeline_mode = #tpu.pipeline_mode<synchronous>, transform_indices = @transform_9, window_bounds = array<i64: 256, 128>}, {pipeline_mode = #tpu.pipeline_mode<synchronous>, transform_indices = @transform_10, window_bounds = array<i64: 1, 128>}, {pipeline_mode = #tpu.pipeline_mode<synchronous>, transform_indices = @transform_11, window_bounds = array<i64: 1, 128>}, {pipeline_mode = #tpu.pipeline_mode<synchronous>, transform_indices = @transform_12, window_bounds = array<i64: 1, 128>}, {transform_indices = @transform_13, window_bounds = array<i64: 1, 1, 128>}]} {
    %c0_i32 = arith.constant 0 : i32
    %0 = arith.cmpi eq, %arg1, %c0_i32 : i32
    %1 = arith.extui %0 : i1 to i32
    %c0_i32_0 = arith.constant 0 : i32
    %2 = arith.cmpi ne, %1, %c0_i32_0 : i32
    scf.if %2 {
      %cst_57 = arith.constant 0.000000e+00 : f32
      %111 = vector.broadcast %cst_57 : f32 to vector<1x1x128xf32>
      %c0_58 = arith.constant 0 : index
      %c0_59 = arith.constant 0 : index
      %c0_60 = arith.constant 0 : index
      %112 = vector.load %arg15[%c0_58, %c0_59, %c0_60] : memref<1x1x128xf32, #tpu.memory_space<vmem>>, vector<1x1x128xf32>
      tpu.vector_store %arg15[%c0_58, %c0_59, %c0_60], %111 {strides = array<i32>} : memref<1x1x128xf32, #tpu.memory_space<vmem>>, vector<1x1x128xf32>,
    } else {
    }
    %c0 = arith.constant 0 : index
    %c0_1 = arith.constant 0 : index
    %3 = vector.load %arg2[%c0, %c0_1] : memref<8x128xf32, #tpu.memory_space<vmem>>, vector<8x128xf32>
    %c0_2 = arith.constant 0 : index
    %c0_3 = arith.constant 0 : index
    %4 = vector.load %arg3[%c0_2, %c0_3] : memref<128x512xf32, #tpu.memory_space<vmem>>, vector<128x512xf32>
    %cst = arith.constant dense<0.000000e+00> : vector<8x512xf32>
    %5 = tpu.matmul %3, %4, %cst {dimension_numbers = #tpu.dot_dimension_numbers<[1], [0], [0], [1], [0, 0, 1, 1], [], []>} : vector<8x128xf32>, vector<128x512xf32>, vector<8x512xf32> -> vector<8x512xf32>
    %c0_4 = arith.constant 0 : index
    %c0_5 = arith.constant 0 : index
    %6 = vector.load %arg4[%c0_4, %c0_5] : memref<1x512xf32, #tpu.memory_space<vmem>>, vector<1x512xf32>
    %7 = vector.broadcast %6 : vector<1x512xf32> to vector<8x512xf32>
    %8 = arith.addf %5, %7 : vector<8x512xf32>
    %c0_6 = arith.constant 0 : index
    %c0_7 = arith.constant 0 : index
    %9 = vector.load %arg5[%c0_6, %c0_7] : memref<1x512xf32, #tpu.memory_space<vmem>>, vector<1x512xf32>
    %c0_8 = arith.constant 0 : index
    %c0_9 = arith.constant 0 : index
    %10 = vector.load %arg6[%c0_8, %c0_9] : memref<1x512xf32, #tpu.memory_space<vmem>>, vector<1x512xf32>
    %cst_10 = arith.constant dense<0.000000e+00> : vector<8xf32>
    %11 = vector.multi_reduction <add>, %8, %cst_10 [1] : vector<8x512xf32> to vector<8xf32>
    %12 = vector.shape_cast %11 : vector<8xf32> to vector<8x1xf32>
    %13 = arith.mulf %8, %8 : vector<8x512xf32>
    %cst_11 = arith.constant dense<0.000000e+00> : vector<8xf32>
    %14 = vector.multi_reduction <add>, %13, %cst_11 [1] : vector<8x512xf32> to vector<8xf32>
    %15 = vector.shape_cast %14 : vector<8xf32> to vector<8x1xf32>
    %cst_12 = arith.constant 0.001953125 : f32
    %16 = vector.broadcast %cst_12 : f32 to vector<8x1xf32>
    %17 = arith.mulf %12, %16 : vector<8x1xf32>
    %cst_13 = arith.constant 0.001953125 : f32
    %18 = vector.broadcast %cst_13 : f32 to vector<8x1xf32>
    %19 = arith.mulf %15, %18 : vector<8x1xf32>
    %20 = arith.mulf %17, %17 : vector<8x1xf32>
    %21 = arith.subf %19, %20 : vector<8x1xf32>
    %cst_14 = arith.constant 0.000000e+00 : f32
    %22 = vector.broadcast %cst_14 : f32 to vector<8x1xf32>
    %23 = arith.maximumf %21, %22 : vector<8x1xf32>
    %cst_15 = arith.constant 9.99999974E-6 : f32
    %24 = vector.broadcast %cst_15 : f32 to vector<8x1xf32>
    %25 = arith.addf %23, %24 : vector<8x1xf32>
    %26 = math.rsqrt %25 : vector<8x1xf32>
    %27 = vector.broadcast %17 : vector<8x1xf32> to vector<8x512xf32>
    %28 = arith.subf %8, %27 : vector<8x512xf32>
    %29 = vector.broadcast %26 : vector<8x1xf32> to vector<8x512xf32>
    %30 = arith.mulf %28, %29 : vector<8x512xf32>
    %31 = vector.broadcast %9 : vector<1x512xf32> to vector<8x512xf32>
    %32 = arith.mulf %30, %31 : vector<8x512xf32>
    %33 = vector.broadcast %10 : vector<1x512xf32> to vector<8x512xf32>
    %34 = arith.addf %32, %33 : vector<8x512xf32>
    %cst_16 = arith.constant 0.000000e+00 : f32
    %35 = vector.broadcast %cst_16 : f32 to vector<8x512xf32>
    %36 = arith.maximumf %34, %35 : vector<8x512xf32>
    %c0_17 = arith.constant 0 : index
    %c0_18 = arith.constant 0 : index
    %37 = vector.load %arg7[%c0_17, %c0_18] : memref<512x256xf32, #tpu.memory_space<vmem>>, vector<512x256xf32>
    %cst_19 = arith.constant dense<0.000000e+00> : vector<8x256xf32>
    %38 = tpu.matmul %36, %37, %cst_19 {dimension_numbers = #tpu.dot_dimension_numbers<[1], [0], [0], [1], [0, 0, 1, 1], [], []>} : vector<8x512xf32>, vector<512x256xf32>, vector<8x256xf32> -> vector<8x256xf32>
    %c0_20 = arith.constant 0 : index
    %c0_21 = arith.constant 0 : index
    %39 = vector.load %arg8[%c0_20, %c0_21] : memref<1x256xf32, #tpu.memory_space<vmem>>, vector<1x256xf32>
    %40 = vector.broadcast %39 : vector<1x256xf32> to vector<8x256xf32>
    %41 = arith.addf %38, %40 : vector<8x256xf32>
    %c0_22 = arith.constant 0 : index
    %c0_23 = arith.constant 0 : index
    %42 = vector.load %arg9[%c0_22, %c0_23] : memref<1x256xf32, #tpu.memory_space<vmem>>, vector<1x256xf32>
    %c0_24 = arith.constant 0 : index
    %c0_25 = arith.constant 0 : index
    %43 = vector.load %arg10[%c0_24, %c0_25] : memref<1x256xf32, #tpu.memory_space<vmem>>, vector<1x256xf32>
    %cst_26 = arith.constant dense<0.000000e+00> : vector<8xf32>
    %44 = vector.multi_reduction <add>, %41, %cst_26 [1] : vector<8x256xf32> to vector<8xf32>
    %45 = vector.shape_cast %44 : vector<8xf32> to vector<8x1xf32>
    %46 = arith.mulf %41, %41 : vector<8x256xf32>
    %cst_27 = arith.constant dense<0.000000e+00> : vector<8xf32>
    %47 = vector.multi_reduction <add>, %46, %cst_27 [1] : vector<8x256xf32> to vector<8xf32>
    %48 = vector.shape_cast %47 : vector<8xf32> to vector<8x1xf32>
    %cst_28 = arith.constant 3.906250e-03 : f32
    %49 = vector.broadcast %cst_28 : f32 to vector<8x1xf32>
    %50 = arith.mulf %45, %49 : vector<8x1xf32>
    %cst_29 = arith.constant 3.906250e-03 : f32
    %51 = vector.broadcast %cst_29 : f32 to vector<8x1xf32>
    %52 = arith.mulf %48, %51 : vector<8x1xf32>
    %53 = arith.mulf %50, %50 : vector<8x1xf32>
    %54 = arith.subf %52, %53 : vector<8x1xf32>
    %cst_30 = arith.constant 0.000000e+00 : f32
    %55 = vector.broadcast %cst_30 : f32 to vector<8x1xf32>
    %56 = arith.maximumf %54, %55 : vector<8x1xf32>
    %cst_31 = arith.constant 9.99999974E-6 : f32
    %57 = vector.broadcast %cst_31 : f32 to vector<8x1xf32>
    %58 = arith.addf %56, %57 : vector<8x1xf32>
    %59 = math.rsqrt %58 : vector<8x1xf32>
    %60 = vector.broadcast %50 : vector<8x1xf32> to vector<8x256xf32>
    %61 = arith.subf %41, %60 : vector<8x256xf32>
    %62 = vector.broadcast %59 : vector<8x1xf32> to vector<8x256xf32>
    %63 = arith.mulf %61, %62 : vector<8x256xf32>
    %64 = vector.broadcast %42 : vector<1x256xf32> to vector<8x256xf32>
    %65 = arith.mulf %63, %64 : vector<8x256xf32>
    %66 = vector.broadcast %43 : vector<1x256xf32> to vector<8x256xf32>
    %67 = arith.addf %65, %66 : vector<8x256xf32>
    %cst_32 = arith.constant 0.000000e+00 : f32
    %68 = vector.broadcast %cst_32 : f32 to vector<8x256xf32>
    %69 = arith.maximumf %67, %68 : vector<8x256xf32>
    %c0_33 = arith.constant 0 : index
    %c0_34 = arith.constant 0 : index
    %70 = vector.load %arg11[%c0_33, %c0_34] : memref<256x128xf32, #tpu.memory_space<vmem>>, vector<256x128xf32>
    %cst_35 = arith.constant dense<0.000000e+00> : vector<8x128xf32>
    %71 = tpu.matmul %69, %70, %cst_35 {dimension_numbers = #tpu.dot_dimension_numbers<[1], [0], [0], [1], [0, 0, 1, 1], [], []>} : vector<8x256xf32>, vector<256x128xf32>, vector<8x128xf32> -> vector<8x128xf32>
    %c0_36 = arith.constant 0 : index
    %c0_37 = arith.constant 0 : index
    %72 = vector.load %arg12[%c0_36, %c0_37] : memref<1x128xf32, #tpu.memory_space<vmem>>, vector<1x128xf32>
    %73 = vector.broadcast %72 : vector<1x128xf32> to vector<8x128xf32>
    %74 = arith.addf %71, %73 : vector<8x128xf32>
    %c0_38 = arith.constant 0 : index
    %c0_39 = arith.constant 0 : index
    %75 = vector.load %arg13[%c0_38, %c0_39] : memref<1x128xf32, #tpu.memory_space<vmem>>, vector<1x128xf32>
    %c0_40 = arith.constant 0 : index
    %c0_41 = arith.constant 0 : index
    %76 = vector.load %arg14[%c0_40, %c0_41] : memref<1x128xf32, #tpu.memory_space<vmem>>, vector<1x128xf32>
    %cst_42 = arith.constant dense<0.000000e+00> : vector<8xf32>
    %77 = vector.multi_reduction <add>, %74, %cst_42 [1] : vector<8x128xf32> to vector<8xf32>
    %78 = vector.shape_cast %77 : vector<8xf32> to vector<8x1xf32>
    %79 = arith.mulf %74, %74 : vector<8x128xf32>
    %cst_43 = arith.constant dense<0.000000e+00> : vector<8xf32>
    %80 = vector.multi_reduction <add>, %79, %cst_43 [1] : vector<8x128xf32> to vector<8xf32>
    %81 = vector.shape_cast %80 : vector<8xf32> to vector<8x1xf32>
    %cst_44 = arith.constant 6.250000e-02 : f32
    %82 = vector.broadcast %cst_44 : f32 to vector<8x1xf32>
    %83 = arith.mulf %78, %82 : vector<8x1xf32>
    %cst_45 = arith.constant 6.250000e-02 : f32
    %84 = vector.broadcast %cst_45 : f32 to vector<8x1xf32>
    %85 = arith.mulf %81, %84 : vector<8x1xf32>
    %86 = arith.mulf %83, %83 : vector<8x1xf32>
    %87 = arith.subf %85, %86 : vector<8x1xf32>
    %cst_46 = arith.constant 0.000000e+00 : f32
    %88 = vector.broadcast %cst_46 : f32 to vector<8x1xf32>
    %89 = arith.maximumf %87, %88 : vector<8x1xf32>
    %cst_47 = arith.constant 9.99999974E-6 : f32
    %90 = vector.broadcast %cst_47 : f32 to vector<8x1xf32>
    %91 = arith.addf %89, %90 : vector<8x1xf32>
    %92 = math.rsqrt %91 : vector<8x1xf32>
    %93 = vector.broadcast %83 : vector<8x1xf32> to vector<8x128xf32>
    %94 = arith.subf %74, %93 : vector<8x128xf32>
    %95 = vector.broadcast %92 : vector<8x1xf32> to vector<8x128xf32>
    %96 = arith.mulf %94, %95 : vector<8x128xf32>
    %97 = vector.broadcast %75 : vector<1x128xf32> to vector<8x128xf32>
    %98 = arith.mulf %96, %97 : vector<8x128xf32>
    %99 = vector.broadcast %76 : vector<1x128xf32> to vector<8x128xf32>
    %100 = arith.addf %98, %99 : vector<8x128xf32>
    %101 = math.tanh %100 : vector<8x128xf32>
    %c0_48 = arith.constant 0 : index
    %c0_49 = arith.constant 0 : index
    %c0_50 = arith.constant 0 : index
    %102 = vector.load %arg15[%c0_48, %c0_49, %c0_50] : memref<1x1x128xf32, #tpu.memory_space<vmem>>, vector<1x1x128xf32>
    %cst_51 = arith.constant dense<0.000000e+00> : vector<128xf32>
    %103 = vector.multi_reduction <add>, %101, %cst_51 [0] : vector<8x128xf32> to vector<128xf32>
    %104 = vector.shape_cast %103 : vector<128xf32> to vector<1x128xf32>
    %105 = vector.shape_cast %104 : vector<1x128xf32> to vector<1x1x128xf32>
    %106 = arith.addf %102, %105 : vector<1x1x128xf32>
    %c0_52 = arith.constant 0 : index
    %c0_53 = arith.constant 0 : index
    %c0_54 = arith.constant 0 : index
    %107 = vector.load %arg15[%c0_52, %c0_53, %c0_54] : memref<1x1x128xf32, #tpu.memory_space<vmem>>, vector<1x1x128xf32>
    tpu.vector_store %arg15[%c0_52, %c0_53, %c0_54], %106 {strides = array<i32>} : memref<1x1x128xf32, #tpu.memory_space<vmem>>, vector<1x1x128xf32>,
    %c0_i32_55 = arith.constant 0 : i32
    %108 = arith.cmpi eq, %arg1, %c0_i32_55 : i32
    %109 = arith.extui %108 : i1 to i32
    %c0_i32_56 = arith.constant 0 : i32
    %110 = arith.cmpi ne, %109, %c0_i32_56 : i32
    scf.if %110 {
      %c0_57 = arith.constant 0 : index
      %c0_58 = arith.constant 0 : index
      %c0_59 = arith.constant 0 : index
      %111 = vector.load %arg15[%c0_57, %c0_58, %c0_59] : memref<1x1x128xf32, #tpu.memory_space<vmem>>, vector<1x1x128xf32>
      %cst_60 = arith.constant 1.250000e-01 : f32
      %112 = vector.broadcast %cst_60 : f32 to vector<1x1x128xf32>
      %113 = arith.mulf %111, %112 : vector<1x1x128xf32>
      %c0_61 = arith.constant 0 : index
      %c0_62 = arith.constant 0 : index
      %c0_63 = arith.constant 0 : index
      %114 = vector.load %arg15[%c0_61, %c0_62, %c0_63] : memref<1x1x128xf32, #tpu.memory_space<vmem>>, vector<1x1x128xf32>
      tpu.vector_store %arg15[%c0_61, %c0_62, %c0_63], %113 {strides = array<i32>} : memref<1x1x128xf32, #tpu.memory_space<vmem>>, vector<1x1x128xf32>,
    } else {
    }
    return
  }
  func.func @transform_0(%arg0: i32, %arg1: i32) -> (i32, i32) {
    %c1_i32 = arith.constant 1 : i32
    %0 = arith.muli %arg0, %c1_i32 : i32
    %1 = arith.addi %0, %arg1 : i32
    %c0_i32 = arith.constant 0 : i32
    %c0_i32_0 = arith.constant 0 : i32
    return %1, %c0_i32 : i32, i32
  }
  func.func @transform_1(%arg0: i32, %arg1: i32) -> (i32, i32) {
    %c0_i32 = arith.constant 0 : i32
    %c0_i32_0 = arith.constant 0 : i32
    %c0_i32_1 = arith.constant 0 : i32
    return %c0_i32, %c0_i32_0 : i32, i32
  }
  func.func @transform_2(%arg0: i32, %arg1: i32) -> (i32, i32) {
    %c0_i32 = arith.constant 0 : i32
    %c0_i32_0 = arith.constant 0 : i32
    %c0_i32_1 = arith.constant 0 : i32
    return %c0_i32, %c0_i32_0 : i32, i32
  }
  func.func @transform_3(%arg0: i32, %arg1: i32) -> (i32, i32) {
    %c0_i32 = arith.constant 0 : i32
    %c0_i32_0 = arith.constant 0 : i32
    %c0_i32_1 = arith.constant 0 : i32
    return %c0_i32, %c0_i32_0 : i32, i32
  }
  func.func @transform_4(%arg0: i32, %arg1: i32) -> (i32, i32) {
    %c0_i32 = arith.constant 0 : i32
    %c0_i32_0 = arith.constant 0 : i32
    %c0_i32_1 = arith.constant 0 : i32
    return %c0_i32, %c0_i32_0 : i32, i32
  }
  func.func @transform_5(%arg0: i32, %arg1: i32) -> (i32, i32) {
    %c0_i32 = arith.constant 0 : i32
    %c0_i32_0 = arith.constant 0 : i32
    %c0_i32_1 = arith.constant 0 : i32
    return %c0_i32, %c0_i32_0 : i32, i32
  }
  func.func @transform_6(%arg0: i32, %arg1: i32) -> (i32, i32) {
    %c0_i32 = arith.constant 0 : i32
    %c0_i32_0 = arith.constant 0 : i32
    %c0_i32_1 = arith.constant 0 : i32
    return %c0_i32, %c0_i32_0 : i32, i32
  }
  func.func @transform_7(%arg0: i32, %arg1: i32) -> (i32, i32) {
    %c0_i32 = arith.constant 0 : i32
    %c0_i32_0 = arith.constant 0 : i32
    %c0_i32_1 = arith.constant 0 : i32
    return %c0_i32, %c0_i32_0 : i32, i32
  }
  func.func @transform_8(%arg0: i32, %arg1: i32) -> (i32, i32) {
    %c0_i32 = arith.constant 0 : i32
    %c0_i32_0 = arith.constant 0 : i32
    %c0_i32_1 = arith.constant 0 : i32
    return %c0_i32, %c0_i32_0 : i32, i32
  }
  func.func @transform_9(%arg0: i32, %arg1: i32) -> (i32, i32) {
    %c0_i32 = arith.constant 0 : i32
    %c0_i32_0 = arith.constant 0 : i32
    %c0_i32_1 = arith.constant 0 : i32
    return %c0_i32, %c0_i32_0 : i32, i32
  }
  func.func @transform_10(%arg0: i32, %arg1: i32) -> (i32, i32) {
    %c0_i32 = arith.constant 0 : i32
    %c0_i32_0 = arith.constant 0 : i32
    %c0_i32_1 = arith.constant 0 : i32
    return %c0_i32, %c0_i32_0 : i32, i32
  }
  func.func @transform_11(%arg0: i32, %arg1: i32) -> (i32, i32) {
    %c0_i32 = arith.constant 0 : i32
    %c0_i32_0 = arith.constant 0 : i32
    %c0_i32_1 = arith.constant 0 : i32
    return %c0_i32, %c0_i32_0 : i32, i32
  }
  func.func @transform_12(%arg0: i32, %arg1: i32) -> (i32, i32) {
    %c0_i32 = arith.constant 0 : i32
    %c0_i32_0 = arith.constant 0 : i32
    %c0_i32_1 = arith.constant 0 : i32
    return %c0_i32, %c0_i32_0 : i32, i32
  }
  func.func @transform_13(%arg0: i32, %arg1: i32) -> (i32, i32, i32) {
    %c0_i32 = arith.constant 0 : i32
    %c0_i32_0 = arith.constant 0 : i32
    %c0_i32_1 = arith.constant 0 : i32
    return %arg0, %c0_i32, %c0_i32_0 : i32, i32, i32
  }
}

module attributes {stable_mosaic.version = 11 : i64} {
  func.func @kernel(%arg0: i32, %arg1: i32, %arg2: memref<8x128xf32, #tpu.memory_space<vmem>>, %arg3: memref<128x512xf32, #tpu.memory_space<vmem>>, %arg4: memref<1x512xf32, #tpu.memory_space<vmem>>, %arg5: memref<1x512xf32, #tpu.memory_space<vmem>>, %arg6: memref<1x512xf32, #tpu.memory_space<vmem>>, %arg7: memref<512x256xf32, #tpu.memory_space<vmem>>, %arg8: memref<1x256xf32, #tpu.memory_space<vmem>>, %arg9: memref<1x256xf32, #tpu.memory_space<vmem>>, %arg10: memref<1x256xf32, #tpu.memory_space<vmem>>, %arg11: memref<256x128xf32, #tpu.memory_space<vmem>>, %arg12: memref<1x128xf32, #tpu.memory_space<vmem>>, %arg13: memref<1x128xf32, #tpu.memory_space<vmem>>, %arg14: memref<1x128xf32, #tpu.memory_space<vmem>>, %arg15: memref<1x1x128xf32, #tpu.memory_space<vmem>>) attributes {dimension_semantics = [#tpu.dimension_semantics<parallel>, #tpu.dimension_semantics<arbitrary>], iteration_bounds = array<i64: 1, 1>, scalar_prefetch = 0 : i64, scratch_operands = 0 : i64, tpu.core_type = #tpu.core_type<tc>, window_params = [{transform_indices = @transform_0, window_bounds = array<i64: 8, 128>}, {pipeline_mode = #tpu.pipeline_mode<synchronous>, transform_indices = @transform_1, window_bounds = array<i64: 128, 512>}, {pipeline_mode = #tpu.pipeline_mode<synchronous>, transform_indices = @transform_2, window_bounds = array<i64: 1, 512>}, {pipeline_mode = #tpu.pipeline_mode<synchronous>, transform_indices = @transform_3, window_bounds = array<i64: 1, 512>}, {pipeline_mode = #tpu.pipeline_mode<synchronous>, transform_indices = @transform_4, window_bounds = array<i64: 1, 512>}, {pipeline_mode = #tpu.pipeline_mode<synchronous>, transform_indices = @transform_5, window_bounds = array<i64: 512, 256>}, {pipeline_mode = #tpu.pipeline_mode<synchronous>, transform_indices = @transform_6, window_bounds = array<i64: 1, 256>}, {pipeline_mode = #tpu.pipeline_mode<synchronous>, transform_indices = @transform_7, window_bounds = array<i64: 1, 256>}, {pipeline_mode = #tpu.pipeline_mode<synchronous>, transform_indices = @transform_8, window_bounds = array<i64: 1, 256>}, {pipeline_mode = #tpu.pipeline_mode<synchronous>, transform_indices = @transform_9, window_bounds = array<i64: 256, 128>}, {pipeline_mode = #tpu.pipeline_mode<synchronous>, transform_indices = @transform_10, window_bounds = array<i64: 1, 128>}, {pipeline_mode = #tpu.pipeline_mode<synchronous>, transform_indices = @transform_11, window_bounds = array<i64: 1, 128>}, {pipeline_mode = #tpu.pipeline_mode<synchronous>, transform_indices = @transform_12, window_bounds = array<i64: 1, 128>}, {transform_indices = @transform_13, window_bounds = array<i64: 1, 1, 128>}]} {
    %c0_i32 = arith.constant 0 : i32
    %0 = arith.cmpi eq, %arg1, %c0_i32 : i32
    %1 = arith.extui %0 : i1 to i32
    %c0_i32_0 = arith.constant 0 : i32
    %2 = arith.cmpi ne, %1, %c0_i32_0 : i32
    scf.if %2 {
      %cst_57 = arith.constant 0.000000e+00 : f32
      %111 = vector.broadcast %cst_57 : f32 to vector<1x1x128xf32>
      %c0_58 = arith.constant 0 : index
      %c0_59 = arith.constant 0 : index
      %c0_60 = arith.constant 0 : index
      %112 = vector.load %arg15[%c0_58, %c0_59, %c0_60] : memref<1x1x128xf32, #tpu.memory_space<vmem>>, vector<1x1x128xf32>
      tpu.vector_store %arg15[%c0_58, %c0_59, %c0_60], %111 {strides = array<i32>} : memref<1x1x128xf32, #tpu.memory_space<vmem>>, vector<1x1x128xf32>,
    } else {
    }
    %c0 = arith.constant 0 : index
    %c0_1 = arith.constant 0 : index
    %3 = vector.load %arg2[%c0, %c0_1] : memref<8x128xf32, #tpu.memory_space<vmem>>, vector<8x128xf32>
    %c0_2 = arith.constant 0 : index
    %c0_3 = arith.constant 0 : index
    %4 = vector.load %arg3[%c0_2, %c0_3] : memref<128x512xf32, #tpu.memory_space<vmem>>, vector<128x512xf32>
    %cst = arith.constant dense<0.000000e+00> : vector<8x512xf32>
    %5 = tpu.matmul %3, %4, %cst {dimension_numbers = #tpu.dot_dimension_numbers<[1], [0], [0], [1], [0, 0, 1, 1], [], []>} : vector<8x128xf32>, vector<128x512xf32>, vector<8x512xf32> -> vector<8x512xf32>
    %c0_4 = arith.constant 0 : index
    %c0_5 = arith.constant 0 : index
    %6 = vector.load %arg4[%c0_4, %c0_5] : memref<1x512xf32, #tpu.memory_space<vmem>>, vector<1x512xf32>
    %7 = vector.broadcast %6 : vector<1x512xf32> to vector<8x512xf32>
    %8 = arith.addf %5, %7 : vector<8x512xf32>
    %c0_6 = arith.constant 0 : index
    %c0_7 = arith.constant 0 : index
    %9 = vector.load %arg5[%c0_6, %c0_7] : memref<1x512xf32, #tpu.memory_space<vmem>>, vector<1x512xf32>
    %c0_8 = arith.constant 0 : index
    %c0_9 = arith.constant 0 : index
    %10 = vector.load %arg6[%c0_8, %c0_9] : memref<1x512xf32, #tpu.memory_space<vmem>>, vector<1x512xf32>
    %cst_10 = arith.constant dense<0.000000e+00> : vector<8xf32>
    %11 = vector.multi_reduction <add>, %8, %cst_10 [1] : vector<8x512xf32> to vector<8xf32>
    %12 = vector.shape_cast %11 : vector<8xf32> to vector<8x1xf32>
    %13 = arith.mulf %8, %8 : vector<8x512xf32>
    %cst_11 = arith.constant dense<0.000000e+00> : vector<8xf32>
    %14 = vector.multi_reduction <add>, %13, %cst_11 [1] : vector<8x512xf32> to vector<8xf32>
    %15 = vector.shape_cast %14 : vector<8xf32> to vector<8x1xf32>
    %cst_12 = arith.constant 0.001953125 : f32
    %16 = vector.broadcast %cst_12 : f32 to vector<8x1xf32>
    %17 = arith.mulf %12, %16 : vector<8x1xf32>
    %cst_13 = arith.constant 0.001953125 : f32
    %18 = vector.broadcast %cst_13 : f32 to vector<8x1xf32>
    %19 = arith.mulf %15, %18 : vector<8x1xf32>
    %20 = arith.mulf %17, %17 : vector<8x1xf32>
    %21 = arith.subf %19, %20 : vector<8x1xf32>
    %cst_14 = arith.constant 0.000000e+00 : f32
    %22 = vector.broadcast %cst_14 : f32 to vector<8x1xf32>
    %23 = arith.maximumf %21, %22 : vector<8x1xf32>
    %cst_15 = arith.constant 9.99999974E-6 : f32
    %24 = vector.broadcast %cst_15 : f32 to vector<8x1xf32>
    %25 = arith.addf %23, %24 : vector<8x1xf32>
    %26 = math.rsqrt %25 : vector<8x1xf32>
    %27 = vector.broadcast %17 : vector<8x1xf32> to vector<8x512xf32>
    %28 = arith.subf %8, %27 : vector<8x512xf32>
    %29 = vector.broadcast %26 : vector<8x1xf32> to vector<8x512xf32>
    %30 = arith.mulf %28, %29 : vector<8x512xf32>
    %31 = vector.broadcast %9 : vector<1x512xf32> to vector<8x512xf32>
    %32 = arith.mulf %30, %31 : vector<8x512xf32>
    %33 = vector.broadcast %10 : vector<1x512xf32> to vector<8x512xf32>
    %34 = arith.addf %32, %33 : vector<8x512xf32>
    %cst_16 = arith.constant 0.000000e+00 : f32
    %35 = vector.broadcast %cst_16 : f32 to vector<8x512xf32>
    %36 = arith.maximumf %34, %35 : vector<8x512xf32>
    %c0_17 = arith.constant 0 : index
    %c0_18 = arith.constant 0 : index
    %37 = vector.load %arg7[%c0_17, %c0_18] : memref<512x256xf32, #tpu.memory_space<vmem>>, vector<512x256xf32>
    %cst_19 = arith.constant dense<0.000000e+00> : vector<8x256xf32>
    %38 = tpu.matmul %36, %37, %cst_19 {dimension_numbers = #tpu.dot_dimension_numbers<[1], [0], [0], [1], [0, 0, 1, 1], [], []>} : vector<8x512xf32>, vector<512x256xf32>, vector<8x256xf32> -> vector<8x256xf32>
    %c0_20 = arith.constant 0 : index
    %c0_21 = arith.constant 0 : index
    %39 = vector.load %arg8[%c0_20, %c0_21] : memref<1x256xf32, #tpu.memory_space<vmem>>, vector<1x256xf32>
    %40 = vector.broadcast %39 : vector<1x256xf32> to vector<8x256xf32>
    %41 = arith.addf %38, %40 : vector<8x256xf32>
    %c0_22 = arith.constant 0 : index
    %c0_23 = arith.constant 0 : index
    %42 = vector.load %arg9[%c0_22, %c0_23] : memref<1x256xf32, #tpu.memory_space<vmem>>, vector<1x256xf32>
    %c0_24 = arith.constant 0 : index
    %c0_25 = arith.constant 0 : index
    %43 = vector.load %arg10[%c0_24, %c0_25] : memref<1x256xf32, #tpu.memory_space<vmem>>, vector<1x256xf32>
    %cst_26 = arith.constant dense<0.000000e+00> : vector<8xf32>
    %44 = vector.multi_reduction <add>, %41, %cst_26 [1] : vector<8x256xf32> to vector<8xf32>
    %45 = vector.shape_cast %44 : vector<8xf32> to vector<8x1xf32>
    %46 = arith.mulf %41, %41 : vector<8x256xf32>
    %cst_27 = arith.constant dense<0.000000e+00> : vector<8xf32>
    %47 = vector.multi_reduction <add>, %46, %cst_27 [1] : vector<8x256xf32> to vector<8xf32>
    %48 = vector.shape_cast %47 : vector<8xf32> to vector<8x1xf32>
    %cst_28 = arith.constant 3.906250e-03 : f32
    %49 = vector.broadcast %cst_28 : f32 to vector<8x1xf32>
    %50 = arith.mulf %45, %49 : vector<8x1xf32>
    %cst_29 = arith.constant 3.906250e-03 : f32
    %51 = vector.broadcast %cst_29 : f32 to vector<8x1xf32>
    %52 = arith.mulf %48, %51 : vector<8x1xf32>
    %53 = arith.mulf %50, %50 : vector<8x1xf32>
    %54 = arith.subf %52, %53 : vector<8x1xf32>
    %cst_30 = arith.constant 0.000000e+00 : f32
    %55 = vector.broadcast %cst_30 : f32 to vector<8x1xf32>
    %56 = arith.maximumf %54, %55 : vector<8x1xf32>
    %cst_31 = arith.constant 9.99999974E-6 : f32
    %57 = vector.broadcast %cst_31 : f32 to vector<8x1xf32>
    %58 = arith.addf %56, %57 : vector<8x1xf32>
    %59 = math.rsqrt %58 : vector<8x1xf32>
    %60 = vector.broadcast %50 : vector<8x1xf32> to vector<8x256xf32>
    %61 = arith.subf %41, %60 : vector<8x256xf32>
    %62 = vector.broadcast %59 : vector<8x1xf32> to vector<8x256xf32>
    %63 = arith.mulf %61, %62 : vector<8x256xf32>
    %64 = vector.broadcast %42 : vector<1x256xf32> to vector<8x256xf32>
    %65 = arith.mulf %63, %64 : vector<8x256xf32>
    %66 = vector.broadcast %43 : vector<1x256xf32> to vector<8x256xf32>
    %67 = arith.addf %65, %66 : vector<8x256xf32>
    %cst_32 = arith.constant 0.000000e+00 : f32
    %68 = vector.broadcast %cst_32 : f32 to vector<8x256xf32>
    %69 = arith.maximumf %67, %68 : vector<8x256xf32>
    %c0_33 = arith.constant 0 : index
    %c0_34 = arith.constant 0 : index
    %70 = vector.load %arg11[%c0_33, %c0_34] : memref<256x128xf32, #tpu.memory_space<vmem>>, vector<256x128xf32>
    %cst_35 = arith.constant dense<0.000000e+00> : vector<8x128xf32>
    %71 = tpu.matmul %69, %70, %cst_35 {dimension_numbers = #tpu.dot_dimension_numbers<[1], [0], [0], [1], [0, 0, 1, 1], [], []>} : vector<8x256xf32>, vector<256x128xf32>, vector<8x128xf32> -> vector<8x128xf32>
    %c0_36 = arith.constant 0 : index
    %c0_37 = arith.constant 0 : index
    %72 = vector.load %arg12[%c0_36, %c0_37] : memref<1x128xf32, #tpu.memory_space<vmem>>, vector<1x128xf32>
    %73 = vector.broadcast %72 : vector<1x128xf32> to vector<8x128xf32>
    %74 = arith.addf %71, %73 : vector<8x128xf32>
    %c0_38 = arith.constant 0 : index
    %c0_39 = arith.constant 0 : index
    %75 = vector.load %arg13[%c0_38, %c0_39] : memref<1x128xf32, #tpu.memory_space<vmem>>, vector<1x128xf32>
    %c0_40 = arith.constant 0 : index
    %c0_41 = arith.constant 0 : index
    %76 = vector.load %arg14[%c0_40, %c0_41] : memref<1x128xf32, #tpu.memory_space<vmem>>, vector<1x128xf32>
    %cst_42 = arith.constant dense<0.000000e+00> : vector<8xf32>
    %77 = vector.multi_reduction <add>, %74, %cst_42 [1] : vector<8x128xf32> to vector<8xf32>
    %78 = vector.shape_cast %77 : vector<8xf32> to vector<8x1xf32>
    %79 = arith.mulf %74, %74 : vector<8x128xf32>
    %cst_43 = arith.constant dense<0.000000e+00> : vector<8xf32>
    %80 = vector.multi_reduction <add>, %79, %cst_43 [1] : vector<8x128xf32> to vector<8xf32>
    %81 = vector.shape_cast %80 : vector<8xf32> to vector<8x1xf32>
    %cst_44 = arith.constant 6.250000e-02 : f32
    %82 = vector.broadcast %cst_44 : f32 to vector<8x1xf32>
    %83 = arith.mulf %78, %82 : vector<8x1xf32>
    %cst_45 = arith.constant 6.250000e-02 : f32
    %84 = vector.broadcast %cst_45 : f32 to vector<8x1xf32>
    %85 = arith.mulf %81, %84 : vector<8x1xf32>
    %86 = arith.mulf %83, %83 : vector<8x1xf32>
    %87 = arith.subf %85, %86 : vector<8x1xf32>
    %cst_46 = arith.constant 0.000000e+00 : f32
    %88 = vector.broadcast %cst_46 : f32 to vector<8x1xf32>
    %89 = arith.maximumf %87, %88 : vector<8x1xf32>
    %cst_47 = arith.constant 9.99999974E-6 : f32
    %90 = vector.broadcast %cst_47 : f32 to vector<8x1xf32>
    %91 = arith.addf %89, %90 : vector<8x1xf32>
    %92 = math.rsqrt %91 : vector<8x1xf32>
    %93 = vector.broadcast %83 : vector<8x1xf32> to vector<8x128xf32>
    %94 = arith.subf %74, %93 : vector<8x128xf32>
    %95 = vector.broadcast %92 : vector<8x1xf32> to vector<8x128xf32>
    %96 = arith.mulf %94, %95 : vector<8x128xf32>
    %97 = vector.broadcast %75 : vector<1x128xf32> to vector<8x128xf32>
    %98 = arith.mulf %96, %97 : vector<8x128xf32>
    %99 = vector.broadcast %76 : vector<1x128xf32> to vector<8x128xf32>
    %100 = arith.addf %98, %99 : vector<8x128xf32>
    %101 = math.tanh %100 : vector<8x128xf32>
    %c0_48 = arith.constant 0 : index
    %c0_49 = arith.constant 0 : index
    %c0_50 = arith.constant 0 : index
    %102 = vector.load %arg15[%c0_48, %c0_49, %c0_50] : memref<1x1x128xf32, #tpu.memory_space<vmem>>, vector<1x1x128xf32>
    %cst_51 = arith.constant dense<0.000000e+00> : vector<128xf32>
    %103 = vector.multi_reduction <add>, %101, %cst_51 [0] : vector<8x128xf32> to vector<128xf32>
    %104 = vector.shape_cast %103 : vector<128xf32> to vector<1x128xf32>
    %105 = vector.shape_cast %104 : vector<1x128xf32> to vector<1x1x128xf32>
    %106 = arith.addf %102, %105 : vector<1x1x128xf32>
    %c0_52 = arith.constant 0 : index
    %c0_53 = arith.constant 0 : index
    %c0_54 = arith.constant 0 : index
    %107 = vector.load %arg15[%c0_52, %c0_53, %c0_54] : memref<1x1x128xf32, #tpu.memory_space<vmem>>, vector<1x1x128xf32>
    tpu.vector_store %arg15[%c0_52, %c0_53, %c0_54], %106 {strides = array<i32>} : memref<1x1x128xf32, #tpu.memory_space<vmem>>, vector<1x1x128xf32>,
    %c0_i32_55 = arith.constant 0 : i32
    %108 = arith.cmpi eq, %arg1, %c0_i32_55 : i32
    %109 = arith.extui %108 : i1 to i32
    %c0_i32_56 = arith.constant 0 : i32
    %110 = arith.cmpi ne, %109, %c0_i32_56 : i32
    scf.if %110 {
      %c0_57 = arith.constant 0 : index
      %c0_58 = arith.constant 0 : index
      %c0_59 = arith.constant 0 : index
      %111 = vector.load %arg15[%c0_57, %c0_58, %c0_59] : memref<1x1x128xf32, #tpu.memory_space<vmem>>, vector<1x1x128xf32>
      %cst_60 = arith.constant 1.250000e-01 : f32
      %112 = vector.broadcast %cst_60 : f32 to vector<1x1x128xf32>
      %113 = arith.mulf %111, %112 : vector<1x1x128xf32>
      %c0_61 = arith.constant 0 : index
      %c0_62 = arith.constant 0 : index
      %c0_63 = arith.constant 0 : index
      %114 = vector.load %arg15[%c0_61, %c0_62, %c0_63] : memref<1x1x128xf32, #tpu.memory_space<vmem>>, vector<1x1x128xf32>
      tpu.vector_store %arg15[%c0_61, %c0_62, %c0_63], %113 {strides = array<i32>} : memref<1x1x128xf32, #tpu.memory_space<vmem>>, vector<1x1x128xf32>,
    } else {
    }
    return
  }
  func.func @transform_0(%arg0: i32, %arg1: i32) -> (i32, i32) {
    %c1_i32 = arith.constant 1 : i32
    %0 = arith.muli %arg0, %c1_i32 : i32
    %1 = arith.addi %0, %arg1 : i32
    %c0_i32 = arith.constant 0 : i32
    %c0_i32_0 = arith.constant 0 : i32
    return %1, %c0_i32 : i32, i32
  }
  func.func @transform_1(%arg0: i32, %arg1: i32) -> (i32, i32) {
    %c0_i32 = arith.constant 0 : i32
    %c0_i32_0 = arith.constant 0 : i32
    %c0_i32_1 = arith.constant 0 : i32
    return %c0_i32, %c0_i32_0 : i32, i32
  }
  func.func @transform_2(%arg0: i32, %arg1: i32) -> (i32, i32) {
    %c0_i32 = arith.constant 0 : i32
    %c0_i32_0 = arith.constant 0 : i32
    %c0_i32_1 = arith.constant 0 : i32
    return %c0_i32, %c0_i32_0 : i32, i32
  }
  func.func @transform_3(%arg0: i32, %arg1: i32) -> (i32, i32) {
    %c0_i32 = arith.constant 0 : i32
    %c0_i32_0 = arith.constant 0 : i32
    %c0_i32_1 = arith.constant 0 : i32
    return %c0_i32, %c0_i32_0 : i32, i32
  }
  func.func @transform_4(%arg0: i32, %arg1: i32) -> (i32, i32) {
    %c0_i32 = arith.constant 0 : i32
    %c0_i32_0 = arith.constant 0 : i32
    %c0_i32_1 = arith.constant 0 : i32
    return %c0_i32, %c0_i32_0 : i32, i32
  }
  func.func @transform_5(%arg0: i32, %arg1: i32) -> (i32, i32) {
    %c0_i32 = arith.constant 0 : i32
    %c0_i32_0 = arith.constant 0 : i32
    %c0_i32_1 = arith.constant 0 : i32
    return %c0_i32, %c0_i32_0 : i32, i32
  }
  func.func @transform_6(%arg0: i32, %arg1: i32) -> (i32, i32) {
    %c0_i32 = arith.constant 0 : i32
    %c0_i32_0 = arith.constant 0 : i32
    %c0_i32_1 = arith.constant 0 : i32
    return %c0_i32, %c0_i32_0 : i32, i32
  }
  func.func @transform_7(%arg0: i32, %arg1: i32) -> (i32, i32) {
    %c0_i32 = arith.constant 0 : i32
    %c0_i32_0 = arith.constant 0 : i32
    %c0_i32_1 = arith.constant 0 : i32
    return %c0_i32, %c0_i32_0 : i32, i32
  }
  func.func @transform_8(%arg0: i32, %arg1: i32) -> (i32, i32) {
    %c0_i32 = arith.constant 0 : i32
    %c0_i32_0 = arith.constant 0 : i32
    %c0_i32_1 = arith.constant 0 : i32
    return %c0_i32, %c0_i32_0 : i32, i32
  }
  func.func @transform_9(%arg0: i32, %arg1: i32) -> (i32, i32) {
    %c0_i32 = arith.constant 0 : i32
    %c0_i32_0 = arith.constant 0 : i32
    %c0_i32_1 = arith.constant 0 : i32
    return %c0_i32, %c0_i32_0 : i32, i32
  }
  func.func @transform_10(%arg0: i32, %arg1: i32) -> (i32, i32) {
    %c0_i32 = arith.constant 0 : i32
    %c0_i32_0 = arith.constant 0 : i32
    %c0_i32_1 = arith.constant 0 : i32
    return %c0_i32, %c0_i32_0 : i32, i32
  }
  func.func @transform_11(%arg0: i32, %arg1: i32) -> (i32, i32) {
    %c0_i32 = arith.constant 0 : i32
    %c0_i32_0 = arith.constant 0 : i32
    %c0_i32_1 = arith.constant 0 : i32
    return %c0_i32, %c0_i32_0 : i32, i32
  }
  func.func @transform_12(%arg0: i32, %arg1: i32) -> (i32, i32) {
    %c0_i32 = arith.constant 0 : i32
    %c0_i32_0 = arith.constant 0 : i32
    %c0_i32_1 = arith.constant 0 : i32
    return %c0_i32, %c0_i32_0 : i32, i32
  }
  func.func @transform_13(%arg0: i32, %arg1: i32) -> (i32, i32, i32) {
    %c0_i32 = arith.constant 0 : i32
    %c0_i32_0 = arith.constant 0 : i32
    %c0_i32_1 = arith.constant 0 : i32
    return %arg0, %c0_i32, %c0_i32_0 : i32, i32, i32
  }
}

</mosaic_0001>

<bundles_post_ra>
// kernel: tpu_custom_call.1
= control target key start
LH: loop header
LB: loop body
LE: loop exit
PB: predicated region body
PF: predicated region fallthrough
CT: control target
= control target key end

     0   :  { %18 = vsyncpa [#allocation3], 0  ;;  %s1565_s0 = inlined_call_operand.hbm [shape: f32[8,128], index: 0, kind: input, shape index: {}]   ;;  %s1566_s1 = inlined_call_operand.hbm [shape: f32[128,512], index: 1, kind: input, shape index: {}]   ;;  %s1567_s2 = inlined_call_operand.vmem [shape: f32[1,512], index: 2, kind: input, shape index: {}]   ;;  %s1568_s3 = inlined_call_operand.vmem [shape: f32[1,512], index: 3, kind: input, shape index: {}]   ;;  %s1569_s4 = inlined_call_operand.vmem [shape: f32[1,512], index: 4, kind: input, shape index: {}]   ;;  %s1570_s5 = inlined_call_operand.hbm [shape: f32[512,256], index: 5, kind: input, shape index: {}]   ;;  %s1571_s6 = inlined_call_operand.vmem [shape: f32[1,256], index: 6, kind: input, shape index: {}]   ;;  %s1572_s7 = inlined_call_operand.vmem [shape: f32[1,256], index: 7, kind: input, shape index: {}]   ;;  %s1573_s8 = inlined_call_operand.vmem [shape: f32[1,256], index: 8, kind: input, shape index: {}]   ;;  %s1574_s9 = inlined_call_operand.hbm [shape: f32[256,128], index: 9, kind: input, shape index: {}]   ;;  %s1575_s10 = inlined_call_operand.vmem [shape: f32[1,128], index: 10, kind: input, shape index: {}]   ;;  %s1576_s11 = inlined_call_operand.vmem [shape: f32[1,128], index: 11, kind: input, shape index: {}]   ;;  %s1577_s12 = inlined_call_operand.vmem [shape: f32[1,128], index: 12, kind: input, shape index: {}]   ;;  %s1578_s13 = inlined_call_operand.hbm [shape: f32[1,1,128], index: 13, kind: output, shape index: {}]  }
   0x1   :  { %19 = vsyncpa [#allocation6], 0 }
   0x2   :  { %20 = vsyncpa [#allocation9], 0 }
   0x3   :  { %21 = vsyncpa [#allocation4], 0  ;;  %s1328_s25 = smov [#allocation5]   ;;  %s1210_s29 = scalar_lea.hbm %s1566_s1, 8192 }
   0x4   :  { %s40_s26 = sshll.u32 %s1328_s25, 4  ;;  %p1211_p0 = scmp.ne.s32.totalorder %s1566_s1, %s1210_s29  ;;  %s41_s26 = int_to_ptr.vmem [resolvable:$true] %s40_s26 }
   0x5   :  { %p1214_p1 = scmp.lt.u32.totalorder %s1210_s29, %s1566_s1 }
   0x7   :  { %p1216_p2 = pnand %p1214_p1, %p1211_p0 }
   0x9   :  { %1219 = shalt.err (!%p1216_p2)
}
   0xa   :  { %s1220_s17 = scalar_lea.vmem %s41_s26, 8192  ;;  %p1225_p4 = scmp.lt.s32.totalorder %s41_s26, %s41_s26 }
   0xb   :  { %p1221_p3 = scmp.ne.s32.totalorder %s41_s26, %s1220_s17  ;;  %p1226_p5 = scmp.lt.s32.totalorder %s1220_s17, %s1220_s17 }
   0xd   :  { %p1227_p6 = por %p1226_p5, %p1225_p4 }
   0xf   :  { %p1228_p7 = pnand %p1227_p6, %p1221_p3 }
  0x11   :  { %1231 = shalt.err (!%p1228_p7)
}
  0x12   :  { %s1329_s18 = smov 512   ;;  %s1330_s19 = smov 32  }
  0x13   :  { %46 = dma.hbm_to_vmem [thread:$0]  %s1566_s1, 8192, %s41_s26, [#allocation6], %s1329_s18, %s1329_s18, %s1330_s19  }
  0x14   :  { %s1331_s22 = smov [#allocation2]   ;;  %s1332_s24 = smov [#allocation7]  }
  0x15   :  { %s31_s23 = sshll.u32 %s1331_s22, 4  ;;  %s58_s25 = sshll.u32 %s1332_s24, 4  ;;  %s32_s23 = int_to_ptr.vmem [resolvable:$true] %s31_s23  ;;  %s59_s25 = int_to_ptr.vmem [resolvable:$true] %s58_s25 }
  0x16   :  { %s1232_s29 = scalar_lea.hbm %s1565_s0, 128 }
  0x17   :  { %p1233_p8 = scmp.ne.s32.totalorder %s1565_s0, %s1232_s29  ;;  %p1236_p9 = scmp.lt.u32.totalorder %s1232_s29, %s1565_s0 }
  0x19   :  { %p1238_p10 = pnand %p1236_p9, %p1233_p8 }
  0x1b   :  { %1241 = shalt.err (!%p1238_p10)
}
  0x1c   :  { %s1242_s1 = scalar_lea.vmem %s32_s23, 128  ;;  %p1247_p12 = scmp.lt.s32.totalorder %s32_s23, %s32_s23 }
  0x1d   :  { %p1243_p11 = scmp.ne.s32.totalorder %s32_s23, %s1242_s1  ;;  %p1248_p13 = scmp.lt.s32.totalorder %s1242_s1, %s1242_s1 }
  0x1f   :  { %p1249_p0 = por %p1248_p13, %p1247_p12 }
  0x21   :  { %p1250_p1 = pnand %p1249_p0, %p1243_p11 }
  0x23   :  { %1253 = shalt.err (!%p1250_p1)
}
  0x24   :  { %34 = dma.hbm_to_vmem [thread:$0]  %s1565_s0, 128, %s32_s23, [#allocation3]  }
  0x25   :  { %s1254_s20 = scalar_lea.hbm %s1570_s5, 16384 }
  0x26   :  { %p1255_p2 = scmp.ne.s32.totalorder %s1570_s5, %s1254_s20  ;;  %p1258_p3 = scmp.lt.u32.totalorder %s1254_s20, %s1570_s5 }
  0x28   :  { %p1260_p4 = pnand %p1258_p3, %p1255_p2 }
  0x2a   :  { %1263 = shalt.err (!%p1260_p4)
}
  0x2b   :  { %s1264_s28 = scalar_lea.vmem %s59_s25, 16384  ;;  %p1269_p6 = scmp.lt.s32.totalorder %s59_s25, %s59_s25 }
  0x2c   :  { %p1265_p5 = scmp.ne.s32.totalorder %s59_s25, %s1264_s28  ;;  %p1270_p7 = scmp.lt.s32.totalorder %s1264_s28, %s1264_s28 }
  0x2e   :  { %p1271_p8 = por %p1270_p7, %p1269_p6 }
  0x30   :  { %p1272_p9 = pnand %p1271_p8, %p1265_p5 }
  0x32   :  { %1275 = shalt.err (!%p1272_p9)
}
  0x33   :  { %s1333_s0 = smov 256   ;;  %s1334_s23 = smov 16  }
  0x34   :  { %64 = dma.hbm_to_vmem [thread:$0]  %s1570_s5, 16384, %s59_s25, [#allocation6], %s1333_s0, %s1333_s0, %s1334_s23  }
  0x35   :  { %s1335_s14 = smov [#allocation8]   ;;  %s1276_s26 = scalar_lea.hbm %s1574_s9, 4096 }
  0x36   :  { %s76_s15 = sshll.u32 %s1335_s14, 4  ;;  %p1277_p10 = scmp.ne.s32.totalorder %s1574_s9, %s1276_s26  ;;  %s77_s15 = int_to_ptr.vmem [resolvable:$true] %s76_s15 }
  0x37   :  { %p1280_p11 = scmp.lt.u32.totalorder %s1276_s26, %s1574_s9 }
  0x39   :  { %p1282_p12 = pnand %p1280_p11, %p1277_p10 }
  0x3b   :  { %1285 = shalt.err (!%p1282_p12)
}
  0x3c   :  { %s1286_s21 = scalar_lea.vmem %s77_s15, 4096  ;;  %p1291_p0 = scmp.lt.s32.totalorder %s77_s15, %s77_s15 }
  0x3d   :  { %p1287_p13 = scmp.ne.s32.totalorder %s77_s15, %s1286_s21  ;;  %p1292_p1 = scmp.lt.s32.totalorder %s1286_s21, %s1286_s21 }
  0x3f   :  { %p1293_p2 = por %p1292_p1, %p1291_p0 }
  0x41   :  { %p1294_p3 = pnand %p1293_p2, %p1287_p13 }
  0x43   :  { %1297 = shalt.err (!%p1294_p3)
}
  0x44   :  { %s1336_s5 = smov 128   ;;  %s1337_s25 = smov 8  }
  0x45   :  { %82 = dma.hbm_to_vmem [thread:$0]  %s1574_s9, 4096, %s77_s15, [#allocation9], %s1336_s5, %s1336_s5, %s1337_s25  }
  0x46   :  { %1320 = dma.done.wait [#allocation3], 128  }
  0x47   :  { %1321 = vsyncadd [#allocation3], 4294967168 }
  0x48   :  { %1322 = dma.done.wait [#allocation6], 24576  }
  0x49   :  { %1323 = vsyncadd [#allocation6], 4294942720 }
  0x4a   :  { %1324 = dma.done.wait [#allocation9], 4096  }
  0x4b   :  { %1325 = vsyncadd [#allocation9], 4294963200  ;;  %v1338_v0 = vmov 0.0   ;;  %v109_v1 = vld [vmem:[#allocation5 + $0x8] sm:$0xff]  ;;  %v108_v3 = vld [vmem:[#allocation5] sm:$0xff]  ;;  %s1339_s26 = smov [#allocation10]  }
  0x4c   :  { %106 = vst [vmem:[#allocation10] sm:$0x1] %v1338_v0  ;;  %258 = vmatprep.mubr.f32.mxu1 %v1338_v0  ;;  %v113_v2 = vld [vmem:[#allocation5 + $0x28] sm:$0xff]  ;;  %v112_v5 = vld [vmem:[#allocation5 + $0x20] sm:$0xff]  ;;  %v111_v48 = vld [vmem:[#allocation5 + $0x18] sm:$0xff] }
  0x4d   :  { %v962_v4 = vpack.c.bf16 %v113_v2, %v109_v1  ;;  %v117_v6 = vld [vmem:[#allocation5 + $0x48] sm:$0xff]  ;;  %v964_v8 = vpack.c.bf16 %v112_v5, %v108_v3  ;;  %v116_v10 = vld [vmem:[#allocation5 + $0x40] sm:$0xff]  ;;  %v115_v49 = vld [vmem:[#allocation5 + $0x38] sm:$0xff] }
  0x4e   :  { %v121_v7 = vld [vmem:[#allocation5 + $0x68] sm:$0xff]  ;;  %v120_v11 = vld [vmem:[#allocation5 + $0x60] sm:$0xff]  ;;  %v994_v51 = vpack.c.bf16 %v115_v49, %v111_v48  ;;  %v110_v52 = vld [vmem:[#allocation5 + $0x10] sm:$0xff] }
  0x4f   :  { %v966_v9 = vpack.c.bf16 %v121_v7, %v117_v6  ;;  %v125_v12 = vld [vmem:[#allocation5 + $0x88] sm:$0xff]  ;;  %963 = vmatprep.subr.bf16.mxu1 %v962_v4  ;;  %v968_v14 = vpack.c.bf16 %v120_v11, %v116_v10  ;;  %v124_v16 = vld [vmem:[#allocation5 + $0x80] sm:$0xff]  ;;  %v114_v53 = vld [vmem:[#allocation5 + $0x30] sm:$0xff] }
  0x50   :  { %v129_v13 = vld [vmem:[#allocation5 + $0xa8] sm:$0xff]  ;;  %965 = vmatpush1.bf16.msra.mxu1 %v964_v8  ;;  %v128_v17 = vld [vmem:[#allocation5 + $0xa0] sm:$0xff]  ;;  %v119_v54 = vld [vmem:[#allocation5 + $0x58] sm:$0xff]  ;;  %v996_v57 = vpack.c.bf16 %v114_v53, %v110_v52 }
  0x51   :  { %967 = vmatprep.subr.bf16.mxu1 %v966_v9  ;;  %v970_v15 = vpack.c.bf16 %v129_v13, %v125_v12  ;;  %v133_v18 = vld [vmem:[#allocation5 + $0xc8] sm:$0xff]  ;;  %v972_v20 = vpack.c.bf16 %v128_v17, %v124_v16  ;;  %v132_v22 = vld [vmem:[#allocation5 + $0xc0] sm:$0xff]  ;;  %v123_v55 = vld [vmem:[#allocation5 + $0x78] sm:$0xff] }
  0x52   :  { %v137_v19 = vld [vmem:[#allocation5 + $0xe8] sm:$0xff]  ;;  %v136_v23 = vld [vmem:[#allocation5 + $0xe0] sm:$0xff]  ;;  %v107_v56 = vld [vmem:[#allocation2] sm:$0xff]  ;;  %v998_v58 = vpack.c.bf16 %v123_v55, %v119_v54 }
  0x53   :  { %v974_v21 = vpack.c.bf16 %v137_v19, %v133_v18  ;;  %v141_v24 = vld [vmem:[#allocation5 + $0x108] sm:$0xff]  ;;  %v976_v26 = vpack.c.bf16 %v136_v23, %v132_v22  ;;  %v140_v28 = vld [vmem:[#allocation5 + $0x100] sm:$0xff]  ;;  %v118_v59 = vld [vmem:[#allocation5 + $0x50] sm:$0xff] }
  0x54   :  { %969 = vmatpush1.bf16.msra.mxu1 %v968_v14  ;;  %v145_v25 = vld [vmem:[#allocation5 + $0x128] sm:$0xff]  ;;  %v144_v29 = vld [vmem:[#allocation5 + $0x120] sm:$0xff]  ;;  %v122_v60 = vld [vmem:[#allocation5 + $0x70] sm:$0xff] }
  0x55   :  { %971 = vmatprep.subr.bf16.mxu1 %v970_v15  ;;  %v978_v27 = vpack.c.bf16 %v145_v25, %v141_v24  ;;  %v149_v30 = vld [vmem:[#allocation5 + $0x148] sm:$0xff]  ;;  %v980_v32 = vpack.c.bf16 %v144_v29, %v140_v28  ;;  %v148_v34 = vld [vmem:[#allocation5 + $0x140] sm:$0xff]  ;;  %v127_v61 = vld [vmem:[#allocation5 + $0x98] sm:$0xff]  ;;  %v1000_v63 = vpack.c.bf16 %v122_v60, %v118_v59 }
  0x56   :  { %v153_v31 = vld [vmem:[#allocation5 + $0x168] sm:$0xff]  ;;  %v152_v35 = vld [vmem:[#allocation5 + $0x160] sm:$0xff]  ;;  %v131_v62 = vld [vmem:[#allocation5 + $0xb8] sm:$0xff] }
  0x57   :  { %v982_v33 = vpack.c.bf16 %v153_v31, %v149_v30  ;;  %v157_v36 = vld [vmem:[#allocation5 + $0x188] sm:$0xff]  ;;  %v984_v38 = vpack.c.bf16 %v152_v35, %v148_v34  ;;  %v156_v40 = vld [vmem:[#allocation5 + $0x180] sm:$0xff]  ;;  %v1002_v1 = vpack.c.bf16 %v131_v62, %v127_v61  ;;  %v126_v2 = vld [vmem:[#allocation5 + $0x90] sm:$0xff] }
  0x58   :  { %973 = vmatpush1.bf16.msra.mxu1 %v972_v20  ;;  %v161_v37 = vld [vmem:[#allocation5 + $0x1a8] sm:$0xff]  ;;  %v160_v41 = vld [vmem:[#allocation5 + $0x1a0] sm:$0xff]  ;;  %v130_v3 = vld [vmem:[#allocation5 + $0xb0] sm:$0xff] }
  0x59   :  { %975 = vmatprep.subr.bf16.mxu1 %v974_v21  ;;  %v986_v39 = vpack.c.bf16 %v161_v37, %v157_v36  ;;  %v165_v42 = vld [vmem:[#allocation5 + $0x1c8] sm:$0xff]  ;;  %v988_v44 = vpack.c.bf16 %v160_v41, %v156_v40  ;;  %v164_v46 = vld [vmem:[#allocation5 + $0x1c0] sm:$0xff]  ;;  %v135_v4 = vld [vmem:[#allocation5 + $0xd8] sm:$0xff]  ;;  %v1004_v6 = vpack.c.bf16 %v130_v3, %v126_v2 }
  0x5a   :  { %v169_v43 = vld [vmem:[#allocation5 + $0x1e8] sm:$0xff]  ;;  %v168_v47 = vld [vmem:[#allocation5 + $0x1e0] sm:$0xff]  ;;  %v139_v5 = vld [vmem:[#allocation5 + $0xf8] sm:$0xff] }
  0x5b   :  { %v990_v45 = vpack.c.bf16 %v169_v43, %v165_v42  ;;  %v992_v50 = vpack.c.bf16 %v168_v47, %v164_v46  ;;  %v1006_v7 = vpack.c.bf16 %v139_v5, %v135_v4  ;;  %v134_v8 = vld [vmem:[#allocation5 + $0xd0] sm:$0xff]  ;;  %v143_v10 = vld [vmem:[#allocation5 + $0x118] sm:$0xff]  ;;  %v422_v34 = vld [vmem:[#allocation7 + $0x8] sm:$0xff] }
  0x5c   :  { %977 = vmatpush1.bf16.msra.mxu1 %v976_v26  ;;  %v138_v9 = vld [vmem:[#allocation5 + $0xf0] sm:$0xff]  ;;  %v147_v11 = vld [vmem:[#allocation5 + $0x138] sm:$0xff]  ;;  %v421_v36 = vld [vmem:[#allocation7] sm:$0xff] }
  0x5d   :  { %979 = vmatprep.subr.bf16.mxu1 %v978_v27  ;;  %v1008_v12 = vpack.c.bf16 %v138_v9, %v134_v8  ;;  %v1010_v13 = vpack.c.bf16 %v147_v11, %v143_v10  ;;  %v142_v14 = vld [vmem:[#allocation5 + $0x110] sm:$0xff]  ;;  %v151_v15 = vld [vmem:[#allocation5 + $0x158] sm:$0xff]  ;;  %v425_v43 = vld [vmem:[#allocation7 + $0x20] sm:$0xff] }
  0x5e   :  { %v155_v16 = vld [vmem:[#allocation5 + $0x178] sm:$0xff]  ;;  %v150_v19 = vld [vmem:[#allocation5 + $0x150] sm:$0xff]  ;;  %v429_v49 = vld [vmem:[#allocation7 + $0x40] sm:$0xff] }
  0x5f   :  { %v1014_v18 = vpack.c.bf16 %v155_v16, %v151_v15  ;;  %v154_v20 = vld [vmem:[#allocation5 + $0x170] sm:$0xff]  ;;  %v159_v21 = vld [vmem:[#allocation5 + $0x198] sm:$0xff]  ;;  %v433_v55 = vld [vmem:[#allocation7 + $0x60] sm:$0xff] }
  0x60   :  { %981 = vmatpush1.bf16.msra.mxu1 %v980_v32  ;;  %v163_v22 = vld [vmem:[#allocation5 + $0x1b8] sm:$0xff]  ;;  %v1016_v23 = vpack.c.bf16 %v154_v20, %v150_v19  ;;  %v158_v25 = vld [vmem:[#allocation5 + $0x190] sm:$0xff]  ;;  %v437_v61 = vld [vmem:[#allocation7 + $0x80] sm:$0xff] }
  0x61   :  { %983 = vmatprep.subr.bf16.mxu1 %v982_v33  ;;  %v1018_v24 = vpack.c.bf16 %v163_v22, %v159_v21  ;;  %v162_v26 = vld [vmem:[#allocation5 + $0x1b0] sm:$0xff]  ;;  %v167_v27 = vld [vmem:[#allocation5 + $0x1d8] sm:$0xff]  ;;  %v441_v4 = vld [vmem:[#allocation7 + $0xa0] sm:$0xff] }
  0x62   :  { %v171_v28 = vld [vmem:[#allocation5 + $0x1f8] sm:$0xff]  ;;  %v1020_v29 = vpack.c.bf16 %v162_v26, %v158_v25  ;;  %v166_v31 = vld [vmem:[#allocation5 + $0x1d0] sm:$0xff]  ;;  %v445_v10 = vld [vmem:[#allocation7 + $0xc0] sm:$0xff] }
  0x63   :  { %v1022_v30 = vpack.c.bf16 %v171_v28, %v167_v27  ;;  %v170_v32 = vld [vmem:[#allocation5 + $0x1f0] sm:$0xff]  ;;  %v424_v35 = vld [vmem:[#allocation7 + $0x18] sm:$0xff]  ;;  %v449_v15 = vld [vmem:[#allocation7 + $0xe0] sm:$0xff] }
  0x64   :  { %985 = vmatpush1.bf16.msra.mxu1 %v984_v38  ;;  %v1024_v33 = vpack.c.bf16 %v170_v32, %v166_v31  ;;  %v1026_v37 = vpack.c.bf16 %v424_v35, %v422_v34  ;;  %v423_v38 = vld [vmem:[#allocation7 + $0x10] sm:$0xff]  ;;  %v428_v40 = vld [vmem:[#allocation7 + $0x38] sm:$0xff] }
  0x65   :  { %987 = vmatprep.subr.bf16.mxu1 %v986_v39  ;;  %v426_v39 = vld [vmem:[#allocation7 + $0x28] sm:$0xff]  ;;  %v1028_v41 = vpack.c.bf16 %v423_v38, %v421_v36  ;;  %v432_v46 = vld [vmem:[#allocation7 + $0x58] sm:$0xff]  ;;  %v439_v62 = vld [vmem:[#allocation7 + $0x90] sm:$0xff] }
  0x66   :  { %v1030_v42 = vpack.c.bf16 %v428_v40, %v426_v39  ;;  %1027 = vmatprep.subr.bf16.mxu0 %v1026_v37  ;;  %v436_v52 = vld [vmem:[#allocation7 + $0x78] sm:$0xff]  ;;  %v1044_v2 = vpack.c.bf16 %v439_v62, %v437_v61  ;;  %v443_v5 = vld [vmem:[#allocation7 + $0xb0] sm:$0xff]  ;;  %v461_v62 = vld [vmem:[#allocation7 + $0x140] sm:$0xff] }
  0x67   :  { %1029 = vmatpush1.bf16.msra.mxu0 %v1028_v41  ;;  %v1048_v8 = vpack.c.bf16 %v443_v5, %v441_v4  ;;  %v447_v11 = vld [vmem:[#allocation7 + $0xd0] sm:$0xff]  ;;  %v172_v27 = vld [vmem:[%s1567_s2] sm:$0xf]  ;;  %v465_v5 = vld [vmem:[#allocation7 + $0x160] sm:$0xff] }
  0x68   :  { %989 = vmatpush1.bf16.msra.mxu1 %v988_v44  ;;  %v427_v44 = vld [vmem:[#allocation7 + $0x30] sm:$0xff]  ;;  %1031 = vmatprep.subr.bf16.mxu0 %v1030_v42 }
  0x69   :  { %991 = vmatprep.subr.bf16.mxu1 %v990_v45  ;;  %v430_v45 = vld [vmem:[#allocation7 + $0x48] sm:$0xff]  ;;  %v1032_v47 = vpack.c.bf16 %v427_v44, %v425_v43  ;;  %v451_v16 = vld [vmem:[#allocation7 + $0xf0] sm:$0xff] }
  0x6a   :  { %v1034_v48 = vpack.c.bf16 %v432_v46, %v430_v45  ;;  %v1056_v19 = vpack.c.bf16 %v451_v16, %v449_v15  ;;  %v473_v16 = vld [vmem:[#allocation7 + $0x1a0] sm:$0xff] }
  0x6b   :  { %1033 = vmatpush1.bf16.msra.mxu0 %v1032_v47 }
  0x6c   :  { %993 = vmatpush1.bf16.msra.mxu1 %v992_v50  ;;  %v431_v50 = vld [vmem:[#allocation7 + $0x50] sm:$0xff]  ;;  %1035 = vmatprep.subr.bf16.mxu0 %v1034_v48 }
  0x6d   :  { %995 = vmatprep.subr.bf16.mxu1 %v994_v51  ;;  %v434_v51 = vld [vmem:[#allocation7 + $0x68] sm:$0xff]  ;;  %v1036_v53 = vpack.c.bf16 %v431_v50, %v429_v49  ;;  %v453_v50 = vld [vmem:[#allocation7 + $0x100] sm:$0xff] }
  0x6e   :  { %v1038_v54 = vpack.c.bf16 %v436_v52, %v434_v51  ;;  %v455_v51 = vld [vmem:[#allocation7 + $0x110] sm:$0xff] }
  0x6f   :  { %259 = vmatmul.mubr.f32.vlgmr.msra.gmra.mrb[0].mxu1 %v107_v56  ;;  %1037 = vmatpush1.bf16.msra.mxu0 %v1036_v53  ;;  %v1060_v52 = vpack.c.bf16 %v455_v51, %v453_v50  ;;  %v458_v53 = vld [vmem:[#allocation7 + $0x128] sm:$0xff]  ;;  %v336_v50 = vld [vmem:[%s1568_s3] sm:$0xf] }
  0x70   :  { %997 = vmatpush1.bf16.msra.mxu1 %v996_v57  ;;  %329 = vmatprep.mubr.f32.mxu1 %v1338_v0  ;;  %v146_v0 = vld [vmem:[#allocation5 + $0x130] sm:$0xff]  ;;  %v438_v57 = vld [vmem:[#allocation7 + $0x88] sm:$0xff]  ;;  %v337_v51 = vld [vmem:[%s1569_s4] sm:$0xf] }
  0x71   :  { %999 = vmatprep.subr.bf16.mxu1 %v998_v58  ;;  %v1012_v17 = vpack.c.bf16 %v146_v0, %v142_v14  ;;  %v440_v58 = vld [vmem:[#allocation7 + $0x98] sm:$0xff]  ;;  %1039 = vmatprep.subr.bf16.mxu0 %v1038_v54  ;;  %v1052_v14 = vpack.c.bf16 %v447_v11, %v445_v10  ;;  %v469_v10 = vld [vmem:[#allocation7 + $0x180] sm:$0xff] }
  0x72   :  { %v1042_v60 = vpack.c.bf16 %v440_v58, %v438_v57  ;;  %v460_v54 = vld [vmem:[#allocation7 + $0x138] sm:$0xff]  ;;  %v459_v57 = vld [vmem:[#allocation7 + $0x130] sm:$0xff] }
  0x74   :  { %1001 = vmatpush1.bf16.msra.mxu1 %v1000_v63  ;;  %v442_v63 = vld [vmem:[#allocation7 + $0xa8] sm:$0xff] }
  0x75   :  { %1003 = vmatprep.subr.bf16.mxu1 %v1002_v1  ;;  %v444_v1 = vld [vmem:[#allocation7 + $0xb8] sm:$0xff] }
  0x76   :  { %v1046_v3 = vpack.c.bf16 %v444_v1, %v442_v63  ;;  %v463_v63 = vld [vmem:[#allocation7 + $0x150] sm:$0xff] }
  0x77   :  { %v1068_v1 = vpack.c.bf16 %v463_v63, %v461_v62 }
  0x78   :  { %1005 = vmatpush1.bf16.msra.mxu1 %v1004_v6  ;;  %v446_v6 = vld [vmem:[#allocation7 + $0xc8] sm:$0xff] }
  0x79   :  { %1007 = vmatprep.subr.bf16.mxu1 %v1006_v7  ;;  %v448_v7 = vld [vmem:[#allocation7 + $0xd8] sm:$0xff] }
  0x7a   :  { %v1050_v9 = vpack.c.bf16 %v448_v7, %v446_v6  ;;  %v467_v6 = vld [vmem:[#allocation7 + $0x170] sm:$0xff] }
  0x7b   :  { %v1072_v7 = vpack.c.bf16 %v467_v6, %v465_v5 }
  0x7c   :  { %1009 = vmatpush1.bf16.msra.mxu1 %v1008_v12  ;;  %v450_v12 = vld [vmem:[#allocation7 + $0xe8] sm:$0xff] }
  0x7d   :  { %1011 = vmatprep.subr.bf16.mxu1 %v1010_v13  ;;  %v452_v13 = vld [vmem:[#allocation7 + $0xf8] sm:$0xff] }
  0x7e   :  { %v1054_v0 = vpack.c.bf16 %v452_v13, %v450_v12  ;;  %v471_v12 = vld [vmem:[#allocation7 + $0x190] sm:$0xff]  ;;  %v474_v13 = vld [vmem:[#allocation7 + $0x1a8] sm:$0xff] }
  0x80   :  { %1013 = vmatpush1.bf16.msra.mxu1 %v1012_v17  ;;  %v454_v17 = vld [vmem:[#allocation7 + $0x108] sm:$0xff] }
  0x81   :  { %1015 = vmatprep.subr.bf16.mxu1 %v1014_v18  ;;  %v456_v18 = vld [vmem:[#allocation7 + $0x118] sm:$0xff] }
  0x82   :  { %v1058_v20 = vpack.c.bf16 %v456_v18, %v454_v17  ;;  %v475_v17 = vld [vmem:[#allocation7 + $0x1b0] sm:$0xff]  ;;  %v478_v18 = vld [vmem:[#allocation7 + $0x1c8] sm:$0xff] }
  0x84   :  { %1017 = vmatpush1.bf16.msra.mxu1 %v1016_v23  ;;  %v174_v23 = vlaneseq }
  0x85   :  { %1019 = vmatprep.subr.bf16.mxu1 %v1018_v24 }
  0x86   :  { %v175_v24 = vshrl.u32 %v174_v23, 7  ;;  %v479_v23 = vld [vmem:[#allocation7 + $0x1d0] sm:$0xff] }
  0x88   :  { %1021 = vmatpush1.bf16.msra.mxu1 %v1020_v29  ;;  %v1461_v25 = vsub.s32 0, %v175_v24  ;;  %v1463_v26 = vsub.s32 1, %v175_v24  ;;  %v1472_v31 = vsub.s32 3, %v175_v24 }
  0x89   :  { %1023 = vmatprep.subr.bf16.mxu1 %v1022_v30  ;;  %v1470_v30 = vsub.s32 2, %v175_v24  ;;  %v482_v24 = vld [vmem:[#allocation7 + $0x1e8] sm:$0xff] }
  0x8a   :  { %v177_v28 = vrot.slane %v172_v27, %v1461_v25  ;;  %v181_v29 = vrot.slane %v172_v27, %v1463_v26  ;;  %v189_v35 = vrot.slane %v172_v27, %v1472_v31  ;;  %v396_v62 = vrot.slane %v337_v51, %v1461_v25 }
  0x8b   :  { %v185_v34 = vrot.slane %v172_v27, %v1470_v30  ;;  %v484_v27 = vld [vmem:[#allocation7 + $0x1f8] sm:$0xff]  ;;  %v408_v63 = vrot.slane %v337_v51, %v1472_v31 }
  0x8c   :  { %1025 = vmatpush1.bf16.msra.mxu1 %v1024_v33 }
  0x8f   :  { %330 = vmatmul.mubr.f32.vlgmr.msra.gmra.mrb[2].mxu1 %v107_v56  ;;  %v435_v56 = vld [vmem:[#allocation7 + $0x70] sm:$0xff] }
  0x90   :  { %v1040_v59 = vpack.c.bf16 %v435_v56, %v433_v55  ;;  %v1062_v55 = vpack.c.bf16 %v460_v54, %v458_v53  ;;  %v457_v56 = vld [vmem:[#allocation7 + $0x120] sm:$0xff]  ;;  %v371_v53 = vrot.slane %v336_v50, %v1461_v25  ;;  %v383_v54 = vrot.slane %v336_v50, %v1472_v31 }
  0x91   :  { %v1064_v58 = vpack.c.bf16 %v459_v57, %v457_v56 }
  0x92   :  { %1041 = vmatpush1.bf16.msra.mxu0 %v1040_v59  ;;  %v462_v59 = vld [vmem:[#allocation7 + $0x148] sm:$0xff] }
  0x93   :  { %1043 = vmatprep.subr.bf16.mxu0 %v1042_v60  ;;  %v464_v60 = vld [vmem:[#allocation7 + $0x158] sm:$0xff] }
  0x94   :  { %v1066_v61 = vpack.c.bf16 %v464_v60, %v462_v59 }
  0x96   :  { %1045 = vmatpush1.bf16.msra.mxu0 %v1044_v2  ;;  %v466_v2 = vld [vmem:[#allocation7 + $0x168] sm:$0xff] }
  0x97   :  { %1047 = vmatprep.subr.bf16.mxu0 %v1046_v3  ;;  %v468_v3 = vld [vmem:[#allocation7 + $0x178] sm:$0xff] }
  0x98   :  { %v1070_v4 = vpack.c.bf16 %v468_v3, %v466_v2 }
  0x9a   :  { %1049 = vmatpush1.bf16.msra.mxu0 %v1048_v8  ;;  %v470_v8 = vld [vmem:[#allocation7 + $0x188] sm:$0xff] }
  0x9b   :  { %1051 = vmatprep.subr.bf16.mxu0 %v1050_v9  ;;  %v472_v9 = vld [vmem:[#allocation7 + $0x198] sm:$0xff] }
  0x9c   :  { %v1074_v11 = vpack.c.bf16 %v472_v9, %v470_v8  ;;  %v487_v8 = vld [vmem:[#allocation7 + $0x210] sm:$0xff] }
  0x9e   :  { %1053 = vmatpush1.bf16.msra.mxu0 %v1052_v14  ;;  %v476_v14 = vld [vmem:[#allocation7 + $0x1b8] sm:$0xff] }
  0x9f   :  { %1055 = vmatprep.subr.bf16.mxu0 %v1054_v0  ;;  %v1076_v0 = vpack.c.bf16 %v471_v12, %v469_v10  ;;  %v1078_v15 = vpack.c.bf16 %v476_v14, %v474_v13  ;;  %v492_v12 = vld [vmem:[#allocation7 + $0x238] sm:$0xff] }
  0xa2   :  { %1057 = vmatpush1.bf16.msra.mxu0 %v1056_v19  ;;  %v480_v19 = vld [vmem:[#allocation7 + $0x1d8] sm:$0xff] }
  0xa3   :  { %1059 = vmatprep.subr.bf16.mxu0 %v1058_v20  ;;  %v1080_v20 = vpack.c.bf16 %v475_v17, %v473_v16  ;;  %v491_v16 = vld [vmem:[#allocation7 + $0x230] sm:$0xff] }
  0xa6   :  { %1061 = vmatpush1.bf16.msra.mxu0 %v1060_v52  ;;  %v375_v52 = vrot.slane %v336_v50, %v1463_v26 }
  0xa7   :  { %1063 = vmatprep.subr.bf16.mxu0 %v1062_v55  ;;  %v379_v55 = vrot.slane %v336_v50, %v1470_v30  ;;  %v510_v50 = vld [vmem:[#allocation7 + $0x2c8] sm:$0xff] }
  0xaa   :  { %1065 = vmatpush1.bf16.msra.mxu0 %v1064_v58 }
  0xab   :  { %1067 = vmatprep.subr.bf16.mxu0 %v1066_v61  ;;  %v400_v61 = vrot.slane %v337_v51, %v1463_v26 }
  0xae   :  { %1069 = vmatpush1.bf16.msra.mxu0 %v1068_v1  ;;  %v404_v1 = vrot.slane %v337_v51, %v1470_v30  ;;  %v512_v51 = vld [vmem:[#allocation7 + $0x2d8] sm:$0xff] }
  0xaf   :  { %1071 = vmatprep.subr.bf16.mxu0 %v1070_v4 }
  0xb2   :  { %1073 = vmatpush1.bf16.msra.mxu0 %v1072_v7 }
  0xb3   :  { %1075 = vmatprep.subr.bf16.mxu0 %v1074_v11  ;;  %v490_v11 = vld [vmem:[#allocation7 + $0x228] sm:$0xff] }
  0xb6   :  { %1077 = vmatpush1.bf16.msra.mxu0 %v1076_v0  ;;  %v1094_v0 = vpack.c.bf16 %v492_v12, %v490_v11  ;;  %v525_v11 = vld [vmem:[#allocation7 + $0x340] sm:$0xff]  ;;  %v527_v12 = vld [vmem:[#allocation7 + $0x350] sm:$0xff] }
  0xb7   :  { %1079 = vmatprep.subr.bf16.mxu0 %v1078_v15  ;;  %v489_v15 = vld [vmem:[#allocation7 + $0x220] sm:$0xff] }
  0xba   :  { %1081 = vmatpush1.bf16.msra.mxu0 %v1080_v20  ;;  %v1096_v20 = vpack.c.bf16 %v491_v16, %v489_v15  ;;  %v529_v15 = vld [vmem:[#allocation7 + $0x360] sm:$0xff]  ;;  %v531_v16 = vld [vmem:[#allocation7 + $0x370] sm:$0xff] }
 0x142   :  { %v260_v21 = vpop.f32.mrb[0].mxu1 }
 0x143   :  { %v262_v22 = vpop.f32.mrb[1].mxu1  ;;  %v1474_v32 = vadd.f32 %v260_v21, %v177_v28  ;;  %v1082_v21 = vpack.c.bf16 %v480_v19, %v478_v18  ;;  %v494_v18 = vld [vmem:[#allocation7 + $0x248] sm:$0xff]  ;;  %v496_v19 = vld [vmem:[#allocation7 + $0x258] sm:$0xff] }
 0x144   :  { %v1476_v33 = vadd.f32 %v262_v22, %v181_v29  ;;  %v477_v22 = vld [vmem:[#allocation7 + $0x1c0] sm:$0xff]  ;;  %v1086_v29 = vpack.c.bf16 %v484_v27, %v482_v24  ;;  %v498_v24 = vld [vmem:[#allocation7 + $0x268] sm:$0xff]  ;;  %v500_v27 = vld [vmem:[#allocation7 + $0x278] sm:$0xff] }
 0x145   :  { %v343_v36 = vmul.f32 %v1474_v32, %v1474_v32  ;;  %v1084_v28 = vpack.c.bf16 %v479_v23, %v477_v22  ;;  %1083 = vmatprep.subr.bf16.mxu0 %v1082_v21  ;;  %v1098_v21 = vpack.c.bf16 %v496_v19, %v494_v18  ;;  %v493_v22 = vld [vmem:[#allocation7 + $0x240] sm:$0xff]  ;;  %v495_v23 = vld [vmem:[#allocation7 + $0x250] sm:$0xff]  ;;  %v536_v18 = vld [vmem:[#allocation7 + $0x398] sm:$0xff]  ;;  %v1136_v19 = vpack.c.bf16 %v531_v16, %v529_v15 }
 0x146   :  { %v344_v37 = vmul.f32 %v1476_v33, %v1476_v33  ;;  %v338_v41 = vadd.f32 %v1476_v33, %v1474_v32  ;;  %v776_v16 = vld [vmem:[#allocation8 + $0xc0] sm:$0xff] }
 0x147   :  { %1085 = vmatpush1.bf16.msra.mxu0 %v1084_v28  ;;  %v1100_v28 = vpack.c.bf16 %v495_v23, %v493_v22  ;;  %v535_v22 = vld [vmem:[#allocation7 + $0x390] sm:$0xff]  ;;  %v538_v23 = vld [vmem:[#allocation7 + $0x3a8] sm:$0xff] }
 0x148   :  { %v347_v45 = vadd.f32 %v344_v37, %v343_v36  ;;  %1087 = vmatprep.subr.bf16.mxu0 %v1086_v29  ;;  %v486_v37 = vld [vmem:[#allocation7 + $0x208] sm:$0xff]  ;;  %v1102_v29 = vpack.c.bf16 %v500_v27, %v498_v24  ;;  %v540_v24 = vld [vmem:[#allocation7 + $0x3b8] sm:$0xff] }
 0x162   :  { %v331_v38 = vpop.f32.mrb[2].mxu1 }
 0x163   :  { %v1484_v39 = vadd.f32 %v331_v38, %v185_v34  ;;  %v333_v40 = vpop.f32.mrb[3].mxu1  ;;  %v481_v34 = vld [vmem:[#allocation7 + $0x1e0] sm:$0xff]  ;;  %v488_v38 = vld [vmem:[#allocation7 + $0x218] sm:$0xff] }
 0x164   :  { %v1488_v42 = vadd.f32 %v333_v40, %v189_v35  ;;  %v483_v35 = vld [vmem:[#allocation7 + $0x1f0] sm:$0xff]  ;;  %v1090_v40 = vpack.c.bf16 %v488_v38, %v486_v37  ;;  %v504_v37 = vld [vmem:[#allocation7 + $0x298] sm:$0xff] }
 0x165   :  { %v345_v43 = vmul.f32 %v1484_v39, %v1484_v39  ;;  %v339_v44 = vadd.f32 %v338_v41, %v1484_v39  ;;  %v1088_v36 = vpack.c.bf16 %v483_v35, %v481_v34  ;;  %v497_v34 = vld [vmem:[#allocation7 + $0x260] sm:$0xff]  ;;  %v499_v35 = vld [vmem:[#allocation7 + $0x270] sm:$0xff] }
 0x166   :  { %v346_v47 = vmul.f32 %v1488_v42, %v1488_v42  ;;  %v1104_v38 = vpack.c.bf16 %v499_v35, %v497_v34  ;;  %v539_v34 = vld [vmem:[#allocation7 + $0x3b0] sm:$0xff]  ;;  %v542_v35 = vld [vmem:[#allocation7 + $0x3c8] sm:$0xff] }
 0x167   :  { %v340_v46 = vadd.f32 %v339_v44, %v1488_v42  ;;  %v348_v48 = vadd.f32 %v347_v45, %v345_v43  ;;  %1089 = vmatpush1.bf16.msra.mxu0 %v1088_v36  ;;  %v502_v36 = vld [vmem:[#allocation7 + $0x288] sm:$0xff] }
 0x168   :  { %1091 = vmatprep.subr.bf16.mxu0 %v1090_v40  ;;  %v1106_v40 = vpack.c.bf16 %v504_v37, %v502_v36  ;;  %v544_v36 = vld [vmem:[#allocation7 + $0x3d8] sm:$0xff] }
 0x169   :  { %341 = vadd.xlane.f32.xlu0 %v340_v46  ;;  %v349_v49 = vadd.f32 %v348_v48, %v346_v47 }
 0x16d   :  { %350 = vadd.xlane.f32.xlu0 %v349_v49 }
 0x1f6   :  { %v342_v41 = vpop.xlane.xlu0 %341 }
 0x1f7   :  { %v352_v43 = vmul.f32 0.001953125, %v342_v41  ;;  %v501_v41 = vld [vmem:[#allocation7 + $0x280] sm:$0xff] }
 0x1f9   :  { %v354_v45 = vmul.f32 %v352_v43, %v352_v43  ;;  %v361_v56 = vsub.f32 %v1484_v39, %v352_v43  ;;  %v360_v57 = vsub.f32 %v1476_v33, %v352_v43  ;;  %v359_v58 = vsub.f32 %v1474_v32, %v352_v43  ;;  %v485_v32 = vld [vmem:[#allocation7 + $0x200] sm:$0xff] }
 0x1fa   :  { %v351_v44 = vpop.xlane.xlu0 %350  ;;  %v362_v59 = vsub.f32 %v1488_v42, %v352_v43  ;;  %v1092_v30 = vpack.c.bf16 %v487_v8, %v485_v32  ;;  %v503_v43 = vld [vmem:[#allocation7 + $0x290] sm:$0xff]  ;;  %v526_v8 = vld [vmem:[#allocation7 + $0x348] sm:$0xff] }
 0x1fb   :  { %v353_v46 = vmul.f32 0.001953125, %v351_v44  ;;  %v506_v44 = vld [vmem:[#allocation7 + $0x2a8] sm:$0xff]  ;;  %v523_v32 = vld [vmem:[#allocation7 + $0x330] sm:$0xff] }
 0x1fd   :  { %v355_v47 = vsub.f32 %v353_v46, %v354_v45  ;;  %v508_v45 = vld [vmem:[#allocation7 + $0x2b8] sm:$0xff]  ;;  %v1108_v46 = vpack.c.bf16 %v503_v43, %v501_v41  ;;  %v543_v41 = vld [vmem:[#allocation7 + $0x3d0] sm:$0xff]  ;;  %v546_v43 = vld [vmem:[#allocation7 + $0x3e8] sm:$0xff] }
 0x1ff   :  { %v356_v48 = vmax.f32 %v355_v47, 0.0  ;;  %v1110_v47 = vpack.c.bf16 %v508_v45, %v506_v44  ;;  %v548_v44 = vld [vmem:[#allocation7 + $0x3f8] sm:$0xff] }
 0x201   :  { %v357_v49 = vadd.f32 1e-05, %v356_v48  ;;  %v505_v48 = vld [vmem:[#allocation7 + $0x2a0] sm:$0xff] }
 0x203   :  { %1202 = vrsqrt.f32 %v357_v49  ;;  %v507_v49 = vld [vmem:[#allocation7 + $0x2b0] sm:$0xff] }
 0x20d   :  { %v1203_v60 = vpop.eup %1202 }
 0x20e   :  { %v364_v2 = vmul.f32 %v1203_v60, %v360_v57  ;;  %v363_v3 = vmul.f32 %v1203_v60, %v359_v58  ;;  %v366_v4 = vmul.f32 %v1203_v60, %v362_v59  ;;  %v365_v5 = vmul.f32 %v1203_v60, %v361_v56  ;;  %v514_v56 = vld [vmem:[#allocation7 + $0x2e8] sm:$0xff]  ;;  %v516_v57 = vld [vmem:[#allocation7 + $0x2f8] sm:$0xff]  ;;  %v513_v60 = vld [vmem:[#allocation7 + $0x2e0] sm:$0xff] }
 0x20f   :  { %v1118_v59 = vpack.c.bf16 %v516_v57, %v514_v56 }
 0x210   :  { %v389_v39 = vmul.f32 %v375_v52, %v364_v2  ;;  %v388_v6 = vmul.f32 %v371_v53, %v363_v3  ;;  %v391_v33 = vmul.f32 %v383_v54, %v366_v4  ;;  %v390_v7 = vmul.f32 %v379_v55, %v365_v5  ;;  %v509_v54 = vld [vmem:[#allocation7 + $0x2c0] sm:$0xff]  ;;  %v511_v55 = vld [vmem:[#allocation7 + $0x2d0] sm:$0xff]  ;;  %v522_v5 = vld [vmem:[#allocation7 + $0x328] sm:$0xff] }
 0x211   :  { %v1112_v52 = vpack.c.bf16 %v507_v49, %v505_v48  ;;  %v1114_v53 = vpack.c.bf16 %v512_v51, %v510_v50  ;;  %v1116_v58 = vpack.c.bf16 %v511_v55, %v509_v54  ;;  %v517_v3 = vld [vmem:[#allocation7 + $0x300] sm:$0xff]  ;;  %v519_v4 = vld [vmem:[#allocation7 + $0x310] sm:$0xff]  ;;  %v549_v51 = vld [vmem:[%s1571_s6] sm:$0x3] }
 0x212   :  { %v414_v42 = vadd.f32 %v400_v61, %v389_v39  ;;  %v413_v9 = vadd.f32 %v396_v62, %v388_v6  ;;  %v416_v10 = vadd.f32 %v408_v63, %v391_v33  ;;  %v1514_v13 = vadd.f32 %v404_v1, %v390_v7  ;;  %v515_v61 = vld [vmem:[#allocation7 + $0x2f0] sm:$0xff]  ;;  %v518_v62 = vld [vmem:[#allocation7 + $0x308] sm:$0xff]  ;;  %v520_v63 = vld [vmem:[#allocation7 + $0x318] sm:$0xff] }
 0x213   :  { %v1120_v1 = vpack.c.bf16 %v515_v61, %v513_v60  ;;  %v1122_v2 = vpack.c.bf16 %v520_v63, %v518_v62  ;;  %v524_v39 = vld [vmem:[#allocation7 + $0x338] sm:$0xff]  ;;  %v1124_v6 = vpack.c.bf16 %v519_v4, %v517_v3  ;;  %v521_v7 = vld [vmem:[#allocation7 + $0x320] sm:$0xff]  ;;  %v547_v48 = vld [vmem:[#allocation7 + $0x3f0] sm:$0xff] }
 0x214   :  { %v418_v31 = vmax.f32 %v414_v42, 0.0  ;;  %v417_v14 = vmax.f32 %v413_v9, 0.0  ;;  %v420_v17 = vmax.f32 %v416_v10, 0.0  ;;  %v1126_v33 = vpack.c.bf16 %v524_v39, %v522_v5  ;;  %v528_v42 = vld [vmem:[#allocation7 + $0x358] sm:$0xff]  ;;  %v768_v61 = vld [vmem:[#allocation8 + $0x80] sm:$0xff]  ;;  %v769_v62 = vld [vmem:[#allocation8 + $0x88] sm:$0xff] }
 0x215   :  { %v1128_v9 = vpack.c.bf16 %v523_v32, %v521_v7  ;;  %v1130_v10 = vpack.c.bf16 %v528_v42, %v526_v8  ;;  %v419_v50 = vmax.f32 %v1514_v13, 0.0  ;;  %v1154_v63 = vpack.c.bf16 %v769_v62, %v768_v61  ;;  %v770_v4 = vld [vmem:[#allocation8 + $0x90] sm:$0xff]  ;;  %v771_v5 = vld [vmem:[#allocation8 + $0x98] sm:$0xff]  ;;  %v772_v32 = vld [vmem:[#allocation8 + $0xa0] sm:$0xff] }
 0x216   :  { %625 = vmatprep.mubr.f32.mxu0 %v418_v31  ;;  %v530_v31 = vld [vmem:[#allocation7 + $0x368] sm:$0xff]  ;;  %v1158_v39 = vpack.c.bf16 %v771_v5, %v770_v4 }
 0x217   :  { %626 = vmatmul.mubr.f32.vlgmr.msra.gmra.mrb[0].mxu0 %v417_v14  ;;  %v532_v14 = vld [vmem:[#allocation7 + $0x378] sm:$0xff]  ;;  %1155 = vmatprep.subr.bf16.mxu1 %v1154_v63  ;;  %v773_v8 = vld [vmem:[#allocation8 + $0xa8] sm:$0xff] }
 0x218   :  { %1093 = vmatpush1.bf16.msra.mxu0 %v1092_v30  ;;  %696 = vmatprep.mubr.f32.mxu0 %v420_v17  ;;  %v1132_v30 = vpack.c.bf16 %v527_v12, %v525_v11  ;;  %v534_v17 = vld [vmem:[#allocation7 + $0x388] sm:$0xff]  ;;  %v1162_v42 = vpack.c.bf16 %v773_v8, %v772_v32  ;;  %v774_v12 = vld [vmem:[#allocation8 + $0xb0] sm:$0xff] }
 0x219   :  { %1095 = vmatprep.subr.bf16.mxu0 %v1094_v0  ;;  %v1134_v0 = vpack.c.bf16 %v532_v14, %v530_v31  ;;  %v775_v31 = vld [vmem:[#allocation8 + $0xb8] sm:$0xff] }
 0x21a   :  { %v1166_v14 = vpack.c.bf16 %v775_v31, %v774_v12 }
 0x21c   :  { %1097 = vmatpush1.bf16.msra.mxu0 %v1096_v20  ;;  %v1138_v20 = vpack.c.bf16 %v536_v18, %v534_v17  ;;  %v777_v17 = vld [vmem:[#allocation8 + $0xc8] sm:$0xff]  ;;  %v760_v18 = vld [vmem:[#allocation8 + $0x40] sm:$0xff] }
 0x21d   :  { %1099 = vmatprep.subr.bf16.mxu0 %v1098_v21  ;;  %v533_v21 = vld [vmem:[#allocation7 + $0x380] sm:$0xff] }
 0x21e   :  { %v1140_v27 = vpack.c.bf16 %v535_v22, %v533_v21  ;;  %v778_v21 = vld [vmem:[#allocation8 + $0xd0] sm:$0xff]  ;;  %v779_v22 = vld [vmem:[#allocation8 + $0xd8] sm:$0xff] }
 0x220   :  { %1101 = vmatpush1.bf16.msra.mxu0 %v1100_v28  ;;  %v1142_v28 = vpack.c.bf16 %v540_v24, %v538_v23  ;;  %v1174_v24 = vpack.c.bf16 %v779_v22, %v778_v21 }
 0x221   :  { %1103 = vmatprep.subr.bf16.mxu0 %v1102_v29  ;;  %v537_v29 = vld [vmem:[#allocation7 + $0x3a0] sm:$0xff] }
 0x222   :  { %v1144_v37 = vpack.c.bf16 %v539_v34, %v537_v29  ;;  %v780_v29 = vld [vmem:[#allocation8 + $0xe0] sm:$0xff]  ;;  %v781_v34 = vld [vmem:[#allocation8 + $0xe8] sm:$0xff] }
 0x224   :  { %1105 = vmatpush1.bf16.msra.mxu0 %v1104_v38  ;;  %v1146_v38 = vpack.c.bf16 %v544_v36, %v542_v35  ;;  %v1178_v36 = vpack.c.bf16 %v781_v34, %v780_v29  ;;  %v892_v34 = vld [vmem:[#allocation10] sm:$0x1] }
 0x225   :  { %1107 = vmatprep.subr.bf16.mxu0 %v1106_v40  ;;  %v541_v40 = vld [vmem:[#allocation7 + $0x3c0] sm:$0xff] }
 0x226   :  { %v1148_v45 = vpack.c.bf16 %v543_v41, %v541_v40  ;;  %v782_v40 = vld [vmem:[#allocation8 + $0xf0] sm:$0xff]  ;;  %v783_v41 = vld [vmem:[#allocation8 + $0xf8] sm:$0xff] }
 0x228   :  { %1109 = vmatpush1.bf16.msra.mxu0 %v1108_v46  ;;  %v1150_v46 = vpack.c.bf16 %v548_v44, %v546_v43  ;;  %v1182_v44 = vpack.c.bf16 %v783_v41, %v782_v40 }
 0x229   :  { %1111 = vmatprep.subr.bf16.mxu0 %v1110_v47  ;;  %v545_v47 = vld [vmem:[#allocation7 + $0x3e0] sm:$0xff] }
 0x22a   :  { %v1152_v49 = vpack.c.bf16 %v547_v48, %v545_v47 }
 0x22c   :  { %1113 = vmatpush1.bf16.msra.mxu0 %v1112_v52  ;;  %v554_v52 = vrot.slane %v549_v51, %v1461_v25 }
 0x22d   :  { %1115 = vmatprep.subr.bf16.mxu0 %v1114_v53  ;;  %v558_v53 = vrot.slane %v549_v51, %v1463_v26 }
 0x230   :  { %1117 = vmatpush1.bf16.msra.mxu0 %v1116_v58 }
 0x231   :  { %1119 = vmatprep.subr.bf16.mxu0 %v1118_v59 }
 0x234   :  { %1121 = vmatpush1.bf16.msra.mxu0 %v1120_v1  ;;  %v752_v1 = vld [vmem:[#allocation8] sm:$0xff] }
 0x235   :  { %1123 = vmatprep.subr.bf16.mxu0 %v1122_v2  ;;  %v753_v2 = vld [vmem:[#allocation8 + $0x8] sm:$0xff] }
 0x236   :  { %v1156_v3 = vpack.c.bf16 %v753_v2, %v752_v1 }
 0x238   :  { %1125 = vmatpush1.bf16.msra.mxu0 %v1124_v6  ;;  %1157 = vmatpush3.bf16.msra.mxu1 %v1156_v3  ;;  %v754_v6 = vld [vmem:[#allocation8 + $0x10] sm:$0xff] }
 0x239   :  { %1127 = vmatprep.subr.bf16.mxu0 %v1126_v33  ;;  %v755_v33 = vld [vmem:[#allocation8 + $0x18] sm:$0xff]  ;;  %1159 = vmatprep.subr.bf16.mxu1 %v1158_v39 }
 0x23a   :  { %v1160_v7 = vpack.c.bf16 %v755_v33, %v754_v6 }
 0x23c   :  { %1129 = vmatpush1.bf16.msra.mxu0 %v1128_v9  ;;  %1161 = vmatpush3.bf16.msra.mxu1 %v1160_v7  ;;  %v756_v9 = vld [vmem:[#allocation8 + $0x20] sm:$0xff] }
 0x23d   :  { %1131 = vmatprep.subr.bf16.mxu0 %v1130_v10  ;;  %v757_v10 = vld [vmem:[#allocation8 + $0x28] sm:$0xff]  ;;  %1163 = vmatprep.subr.bf16.mxu1 %v1162_v42 }
 0x23e   :  { %v1164_v11 = vpack.c.bf16 %v757_v10, %v756_v9 }
 0x240   :  { %1133 = vmatpush1.bf16.msra.mxu0 %v1132_v30  ;;  %1165 = vmatpush3.bf16.msra.mxu1 %v1164_v11  ;;  %v758_v30 = vld [vmem:[#allocation8 + $0x30] sm:$0xff] }
 0x241   :  { %1135 = vmatprep.subr.bf16.mxu0 %v1134_v0  ;;  %v759_v0 = vld [vmem:[#allocation8 + $0x38] sm:$0xff]  ;;  %1167 = vmatprep.subr.bf16.mxu1 %v1166_v14 }
 0x242   :  { %v1168_v15 = vpack.c.bf16 %v759_v0, %v758_v30 }
 0x244   :  { %1137 = vmatpush1.bf16.msra.mxu0 %v1136_v19  ;;  %1169 = vmatpush3.bf16.msra.mxu1 %v1168_v15  ;;  %v1170_v19 = vpack.c.bf16 %v777_v17, %v776_v16  ;;  %v925_v17 = vld [vmem:[%s1576_s11] ss:$0 sm:$0xff]  ;;  %s913_s11 = sshll.u32 %s1339_s26, 4  ;;  %s914_s11 = int_to_ptr.vmem [resolvable:$true] %s913_s11 }
 0x245   :  { %1139 = vmatprep.subr.bf16.mxu0 %v1138_v20  ;;  %v761_v20 = vld [vmem:[#allocation8 + $0x48] sm:$0xff]  ;;  %s1302_s17 = scalar_lea.vmem %s914_s11, 32  ;;  %p1303_p5 = scmp.lt.s32.totalorder %s914_s11, %s914_s11 }
 0x246   :  { %v1172_v23 = vpack.c.bf16 %v761_v20, %v760_v18  ;;  %1171 = vmatprep.subr.bf16.mxu1 %v1170_v19  ;;  %v926_v19 = vld [vmem:[%s1577_s12] ss:$0 sm:$0xff]  ;;  %s1298_s12 = scalar_lea.vmem %s914_s11, 16 }
 0x247   :  { %p1299_p4 = scmp.ne.s32.totalorder %s914_s11, %s1298_s12  ;;  %p1304_p6 = scmp.lt.s32.totalorder %s1302_s17, %s1298_s12 }
 0x248   :  { %1141 = vmatpush1.bf16.msra.mxu0 %v1140_v27  ;;  %v762_v27 = vld [vmem:[#allocation8 + $0x50] sm:$0xff]  ;;  %1173 = vmatpush3.bf16.msra.mxu1 %v1172_v23 }
 0x249   :  { %1143 = vmatprep.subr.bf16.mxu0 %v1142_v28  ;;  %v763_v28 = vld [vmem:[#allocation8 + $0x58] sm:$0xff]  ;;  %1175 = vmatprep.subr.bf16.mxu1 %v1174_v24  ;;  %p1305_p7 = por %p1304_p6, %p1303_p5 }
 0x24a   :  { %v1176_v35 = vpack.c.bf16 %v763_v28, %v762_v27 }
 0x24b   :  { %p1306_p8 = pnand %p1305_p7, %p1299_p4 }
 0x24c   :  { %1145 = vmatpush1.bf16.msra.mxu0 %v1144_v37  ;;  %v764_v37 = vld [vmem:[#allocation8 + $0x60] sm:$0xff]  ;;  %1177 = vmatpush3.bf16.msra.mxu1 %v1176_v35 }
 0x24d   :  { %1147 = vmatprep.subr.bf16.mxu0 %v1146_v38  ;;  %v765_v38 = vld [vmem:[#allocation8 + $0x68] sm:$0xff]  ;;  %1179 = vmatprep.subr.bf16.mxu1 %v1178_v36 }
 0x24e   :  { %v1180_v43 = vpack.c.bf16 %v765_v38, %v764_v37 }
 0x250   :  { %1149 = vmatpush1.bf16.msra.mxu0 %v1148_v45  ;;  %v766_v45 = vld [vmem:[#allocation8 + $0x70] sm:$0xff]  ;;  %1181 = vmatpush3.bf16.msra.mxu1 %v1180_v43 }
 0x251   :  { %1151 = vmatprep.subr.bf16.mxu0 %v1150_v46  ;;  %v767_v46 = vld [vmem:[#allocation8 + $0x78] sm:$0xff]  ;;  %1183 = vmatprep.subr.bf16.mxu1 %v1182_v44 }
 0x252   :  { %v1184_v47 = vpack.c.bf16 %v767_v46, %v766_v45 }
 0x254   :  { %1153 = vmatpush1.bf16.msra.mxu0 %v1152_v49  ;;  %1185 = vmatpush3.bf16.msra.mxu1 %v1184_v47 }
 0x257   :  { %697 = vmatmul.mubr.f32.vlgmr.msra.gmra.mrb[0].mxu0 %v419_v50 }
 0x32a   :  { %v698_v54 = vpop.f32.mrb[0].mxu0 }
 0x32b   :  { %v1522_v55 = vadd.f32 %v698_v54, %v554_v52  ;;  %v700_v56 = vpop.f32.mrb[1].mxu0 }
 0x32c   :  { %v1524_v57 = vadd.f32 %v700_v56, %v558_v53 }
 0x32d   :  { %v708_v13 = vmul.f32 %v1522_v55, %v1522_v55 }
 0x32e   :  { %v705_v58 = vadd.f32 %v1524_v57, %v1522_v55  ;;  %v709_v59 = vmul.f32 %v1524_v57, %v1524_v57 }
 0x330   :  { %706 = vadd.xlane.f32.xlu1 %v705_v58  ;;  %v710_v60 = vadd.f32 %v709_v59, %v708_v13  ;;  %v703_v58 = vld [vmem:[%s1572_s7] sm:$0x3] }
 0x331   :  { %v704_v13 = vld [vmem:[%s1573_s8] sm:$0x3]  ;;  %v728_v61 = vrot.slane %v703_v58, %v1461_v25  ;;  %v732_v62 = vrot.slane %v703_v58, %v1463_v26 }
 0x332   :  { %v741_v2 = vrot.slane %v704_v13, %v1461_v25  ;;  %v745_v3 = vrot.slane %v704_v13, %v1463_v26 }
 0x334   :  { %711 = vadd.xlane.f32.xlu1 %v710_v60 }
 0x3bd   :  { %v707_v48 = vpop.xlane.xlu1 %706 }
 0x3be   :  { %v713_v49 = vmul.f32 0.00390625, %v707_v48 }
 0x3c0   :  { %v715_v51 = vmul.f32 %v713_v49, %v713_v49  ;;  %v720_v59 = vsub.f32 %v1522_v55, %v713_v49  ;;  %v721_v60 = vsub.f32 %v1524_v57, %v713_v49  ;;  %v924_v57 = vld [vmem:[%s1575_s10] ss:$0 sm:$0xff] }
 0x3c1   :  { %v712_v50 = vpop.xlane.xlu1 %711 }
 0x3c2   :  { %v714_v52 = vmul.f32 0.00390625, %v712_v50 }
 0x3c4   :  { %v716_v53 = vsub.f32 %v714_v52, %v715_v51 }
 0x3c6   :  { %v717_v54 = vmax.f32 %v716_v53, 0.0 }
 0x3c8   :  { %v718_v56 = vadd.f32 1e-05, %v717_v54 }
 0x3ca   :  { %1204 = vrsqrt.f32 %v718_v56 }
 0x3d4   :  { %v1205_v63 = vpop.eup %1204 }
 0x3d5   :  { %v723_v1 = vmul.f32 %v1205_v63, %v721_v60  ;;  %v722_v4 = vmul.f32 %v1205_v63, %v720_v59 }
 0x3d7   :  { %v736_v5 = vmul.f32 %v732_v62, %v723_v1  ;;  %v735_v39 = vmul.f32 %v728_v61, %v722_v4 }
 0x3d9   :  { %v749_v6 = vadd.f32 %v745_v3, %v736_v5  ;;  %v748_v33 = vadd.f32 %v741_v2, %v735_v39 }
 0x3db   :  { %v751_v7 = vmax.f32 %v749_v6, 0.0  ;;  %v750_v32 = vmax.f32 %v748_v33, 0.0 }
 0x3dd   :  { %855 = vmatprep.mubr.f32.mxu1 %v751_v7 }
 0x3de   :  { %856 = vmatmul.mubr.f32.vlgmr.msra.gmra.mrb[4].mxu1 %v750_v32 }
 0x4b1   :  { %v959_v55 = vpop.f32.mrb[4].mxu1 }
 0x4b2   :  { %v960_v8 = vpop.f32.mrb[5].mxu1 }
 0x4b3   :  { %v961_v42 = vadd.f32 %v960_v8, %v959_v55 }
 0x4b5   :  { %v858_v9 = vadd.f32 %v961_v42, %v924_v57 }
 0x4b7   :  { %863 = vadd.xlane.f32.xlu0 %v858_v9  ;;  %v865_v25 = vmul.f32 %v858_v9, %v858_v9 }
 0x4b9   :  { %866 = vadd.xlane.f32.xlu1 %v865_v25 }
 0x544   :  { %v864_v26 = vpop.xlane.xlu0 %863 }
 0x545   :  { %v868_v10 = vmul.f32 0.0625, %v864_v26 }
 0x546   :  { %v867_v11 = vpop.xlane.xlu1 %866 }
 0x547   :  { %v870_v12 = vmul.f32 %v868_v10, %v868_v10  ;;  %v869_v31 = vmul.f32 0.0625, %v867_v11  ;;  %v875_v15 = vsub.f32 %v858_v9, %v868_v10 }
 0x549   :  { %v871_v14 = vsub.f32 %v869_v31, %v870_v12 }
 0x54b   :  { %v872_v30 = vmax.f32 %v871_v14, 0.0 }
 0x54d   :  { %v873_v0 = vadd.f32 1e-05, %v872_v30 }
 0x54f   :  { %1206 = vrsqrt.f32 %v873_v0 }
 0x559   :  { %v1207_v16 = vpop.eup %1206 }
 0x55a   :  { %v876_v18 = vmul.f32 %v1207_v16, %v875_v15 }
 0x55c   :  { %v883_v20 = vmul.f32 %v925_v17, %v876_v18 }
 0x55e   :  { %v890_v21 = vadd.f32 %v926_v19, %v883_v20 }
 0x560   :  { %1208 = vtanh.f32 %v890_v21 }
 0x56a   :  { %v1209_v22 = vpop.eup %1208 }
 0x56b   :  { %v893_v23 = vrot.slane %v1209_v22, 4 }
 0x56d   :  { %v894_v24 = vadd.f32 %v1209_v22, %v893_v23 }
 0x56f   :  { %v895_v27 = vrot.slane %v894_v24, 2 }
 0x571   :  { %v896_v28 = vadd.f32 %v895_v27, %v894_v24 }
 0x573   :  { %v897_v29 = vrot.slane %v896_v28, 1 }
 0x575   :  { %v898_v35 = vadd.f32 %v897_v29, %v896_v28 }
 0x577   :  { %v899_v36 = vadd.f32 %v898_v35, %v892_v34 }
 0x579   :  { %900 = vst [vmem:[#allocation10] sm:$0x1] %v899_v36 }
 0x580   :  { %v904_v37 = vld [vmem:[#allocation10] sm:$0x1] }
 0x581   :  { %v905_v38 = vmul.f32 0.125, %v904_v37 }
 0x583   :  { %906 = vst [vmem:[#allocation10] sm:$0x1] %v905_v38 }
 0x584   :  { %1309 = shalt.err (!%p1306_p8)
}
 0x585   :  { %s1310_s20 = scalar_lea.hbm %s1578_s13, 16 }
 0x586   :  { %p1311_p9 = scmp.ne.s32.totalorder %s1578_s13, %s1310_s20  ;;  %p1314_p10 = scmp.lt.u32.totalorder %s1310_s20, %s1578_s13 }
 0x588   :  { %p1316_p11 = pnand %p1314_p10, %p1311_p9 }
 0x58a   :  { %1319 = shalt.err (!%p1316_p11)
}
 0x58b   :  { %916 = dma.vmem_to_hbm [thread:$0]  %s914_s11, 16, %s1578_s13, [#allocation4]  }
 0x58c   :  { %1326 = dma.done.wait [#allocation4], 16  }
 0x58d   :  { %1327 = vsyncadd [#allocation4], 4294967280 }
 0x58e   :  { %920 = vsyncpa [#allocation3], 1 }
 0x58f   :  { %921 = vsyncpa [#allocation6], 1 }
 0x590   :  { %922 = vsyncpa [#allocation9], 1 }
 0x591   :  { %923 = vsyncpa [#allocation4], 1 }

// kernel: tpu_custom_call.1
= control target key start
LH: loop header
LB: loop body
LE: loop exit
PB: predicated region body
PF: predicated region fallthrough
CT: control target
= control target key end

     0   :  { %18 = vsyncpa [#allocation3], 0  ;;  %s1565_s0 = inlined_call_operand.hbm [shape: f32[8,128], index: 0, kind: input, shape index: {}]   ;;  %s1566_s1 = inlined_call_operand.hbm [shape: f32[128,512], index: 1, kind: input, shape index: {}]   ;;  %s1567_s2 = inlined_call_operand.vmem [shape: f32[1,512], index: 2, kind: input, shape index: {}]   ;;  %s1568_s3 = inlined_call_operand.vmem [shape: f32[1,512], index: 3, kind: input, shape index: {}]   ;;  %s1569_s4 = inlined_call_operand.vmem [shape: f32[1,512], index: 4, kind: input, shape index: {}]   ;;  %s1570_s5 = inlined_call_operand.hbm [shape: f32[512,256], index: 5, kind: input, shape index: {}]   ;;  %s1571_s6 = inlined_call_operand.vmem [shape: f32[1,256], index: 6, kind: input, shape index: {}]   ;;  %s1572_s7 = inlined_call_operand.vmem [shape: f32[1,256], index: 7, kind: input, shape index: {}]   ;;  %s1573_s8 = inlined_call_operand.vmem [shape: f32[1,256], index: 8, kind: input, shape index: {}]   ;;  %s1574_s9 = inlined_call_operand.hbm [shape: f32[256,128], index: 9, kind: input, shape index: {}]   ;;  %s1575_s10 = inlined_call_operand.vmem [shape: f32[1,128], index: 10, kind: input, shape index: {}]   ;;  %s1576_s11 = inlined_call_operand.vmem [shape: f32[1,128], index: 11, kind: input, shape index: {}]   ;;  %s1577_s12 = inlined_call_operand.vmem [shape: f32[1,128], index: 12, kind: input, shape index: {}]   ;;  %s1578_s13 = inlined_call_operand.hbm [shape: f32[1,1,128], index: 13, kind: output, shape index: {}]  }
   0x1   :  { %19 = vsyncpa [#allocation6], 0 }
   0x2   :  { %20 = vsyncpa [#allocation9], 0 }
   0x3   :  { %21 = vsyncpa [#allocation4], 0  ;;  %s1328_s25 = smov [#allocation5]   ;;  %s1210_s29 = scalar_lea.hbm %s1566_s1, 8192 }
   0x4   :  { %s40_s26 = sshll.u32 %s1328_s25, 4  ;;  %p1211_p0 = scmp.ne.s32.totalorder %s1566_s1, %s1210_s29  ;;  %s41_s26 = int_to_ptr.vmem [resolvable:$true] %s40_s26 }
   0x5   :  { %p1214_p1 = scmp.lt.u32.totalorder %s1210_s29, %s1566_s1 }
   0x7   :  { %p1216_p2 = pnand %p1214_p1, %p1211_p0 }
   0x9   :  { %1219 = shalt.err (!%p1216_p2)
}
   0xa   :  { %s1220_s17 = scalar_lea.vmem %s41_s26, 8192  ;;  %p1225_p4 = scmp.lt.s32.totalorder %s41_s26, %s41_s26 }
   0xb   :  { %p1221_p3 = scmp.ne.s32.totalorder %s41_s26, %s1220_s17  ;;  %p1226_p5 = scmp.lt.s32.totalorder %s1220_s17, %s1220_s17 }
   0xd   :  { %p1227_p6 = por %p1226_p5, %p1225_p4 }
   0xf   :  { %p1228_p7 = pnand %p1227_p6, %p1221_p3 }
  0x11   :  { %1231 = shalt.err (!%p1228_p7)
}
  0x12   :  { %s1329_s18 = smov 512   ;;  %s1330_s19 = smov 32  }
  0x13   :  { %46 = dma.hbm_to_vmem [thread:$0]  %s1566_s1, 8192, %s41_s26, [#allocation6], %s1329_s18, %s1329_s18, %s1330_s19  }
  0x14   :  { %s1331_s22 = smov [#allocation2]   ;;  %s1332_s24 = smov [#allocation7]  }
  0x15   :  { %s31_s23 = sshll.u32 %s1331_s22, 4  ;;  %s58_s25 = sshll.u32 %s1332_s24, 4  ;;  %s32_s23 = int_to_ptr.vmem [resolvable:$true] %s31_s23  ;;  %s59_s25 = int_to_ptr.vmem [resolvable:$true] %s58_s25 }
  0x16   :  { %s1232_s29 = scalar_lea.hbm %s1565_s0, 128 }
  0x17   :  { %p1233_p8 = scmp.ne.s32.totalorder %s1565_s0, %s1232_s29  ;;  %p1236_p9 = scmp.lt.u32.totalorder %s1232_s29, %s1565_s0 }
  0x19   :  { %p1238_p10 = pnand %p1236_p9, %p1233_p8 }
  0x1b   :  { %1241 = shalt.err (!%p1238_p10)
}
  0x1c   :  { %s1242_s1 = scalar_lea.vmem %s32_s23, 128  ;;  %p1247_p12 = scmp.lt.s32.totalorder %s32_s23, %s32_s23 }
  0x1d   :  { %p1243_p11 = scmp.ne.s32.totalorder %s32_s23, %s1242_s1  ;;  %p1248_p13 = scmp.lt.s32.totalorder %s1242_s1, %s1242_s1 }
  0x1f   :  { %p1249_p0 = por %p1248_p13, %p1247_p12 }
  0x21   :  { %p1250_p1 = pnand %p1249_p0, %p1243_p11 }
  0x23   :  { %1253 = shalt.err (!%p1250_p1)
}
  0x24   :  { %34 = dma.hbm_to_vmem [thread:$0]  %s1565_s0, 128, %s32_s23, [#allocation3]  }
  0x25   :  { %s1254_s20 = scalar_lea.hbm %s1570_s5, 16384 }
  0x26   :  { %p1255_p2 = scmp.ne.s32.totalorder %s1570_s5, %s1254_s20  ;;  %p1258_p3 = scmp.lt.u32.totalorder %s1254_s20, %s1570_s5 }
  0x28   :  { %p1260_p4 = pnand %p1258_p3, %p1255_p2 }
  0x2a   :  { %1263 = shalt.err (!%p1260_p4)
}
  0x2b   :  { %s1264_s28 = scalar_lea.vmem %s59_s25, 16384  ;;  %p1269_p6 = scmp.lt.s32.totalorder %s59_s25, %s59_s25 }
  0x2c   :  { %p1265_p5 = scmp.ne.s32.totalorder %s59_s25, %s1264_s28  ;;  %p1270_p7 = scmp.lt.s32.totalorder %s1264_s28, %s1264_s28 }
  0x2e   :  { %p1271_p8 = por %p1270_p7, %p1269_p6 }
  0x30   :  { %p1272_p9 = pnand %p1271_p8, %p1265_p5 }
  0x32   :  { %1275 = shalt.err (!%p1272_p9)
}
  0x33   :  { %s1333_s0 = smov 256   ;;  %s1334_s23 = smov 16  }
  0x34   :  { %64 = dma.hbm_to_vmem [thread:$0]  %s1570_s5, 16384, %s59_s25, [#allocation6], %s1333_s0, %s1333_s0, %s1334_s23  }
  0x35   :  { %s1335_s14 = smov [#allocation8]   ;;  %s1276_s26 = scalar_lea.hbm %s1574_s9, 4096 }
  0x36   :  { %s76_s15 = sshll.u32 %s1335_s14, 4  ;;  %p1277_p10 = scmp.ne.s32.totalorder %s1574_s9, %s1276_s26  ;;  %s77_s15 = int_to_ptr.vmem [resolvable:$true] %s76_s15 }
  0x37   :  { %p1280_p11 = scmp.lt.u32.totalorder %s1276_s26, %s1574_s9 }
  0x39   :  { %p1282_p12 = pnand %p1280_p11, %p1277_p10 }
  0x3b   :  { %1285 = shalt.err (!%p1282_p12)
}
  0x3c   :  { %s1286_s21 = scalar_lea.vmem %s77_s15, 4096  ;;  %p1291_p0 = scmp.lt.s32.totalorder %s77_s15, %s77_s15 }
  0x3d   :  { %p1287_p13 = scmp.ne.s32.totalorder %s77_s15, %s1286_s21  ;;  %p1292_p1 = scmp.lt.s32.totalorder %s1286_s21, %s1286_s21 }
  0x3f   :  { %p1293_p2 = por %p1292_p1, %p1291_p0 }
  0x41   :  { %p1294_p3 = pnand %p1293_p2, %p1287_p13 }
  0x43   :  { %1297 = shalt.err (!%p1294_p3)
}
  0x44   :  { %s1336_s5 = smov 128   ;;  %s1337_s25 = smov 8  }
  0x45   :  { %82 = dma.hbm_to_vmem [thread:$0]  %s1574_s9, 4096, %s77_s15, [#allocation9], %s1336_s5, %s1336_s5, %s1337_s25  }
  0x46   :  { %1320 = dma.done.wait [#allocation3], 128  }
  0x47   :  { %1321 = vsyncadd [#allocation3], 4294967168 }
  0x48   :  { %1322 = dma.done.wait [#allocation6], 24576  }
  0x49   :  { %1323 = vsyncadd [#allocation6], 4294942720 }
  0x4a   :  { %1324 = dma.done.wait [#allocation9], 4096  }
  0x4b   :  { %1325 = vsyncadd [#allocation9], 4294963200  ;;  %v1338_v0 = vmov 0.0   ;;  %v109_v1 = vld [vmem:[#allocation5 + $0x8] sm:$0xff]  ;;  %v108_v3 = vld [vmem:[#allocation5] sm:$0xff]  ;;  %s1339_s26 = smov [#allocation10]  }
  0x4c   :  { %106 = vst [vmem:[#allocation10] sm:$0x1] %v1338_v0  ;;  %258 = vmatprep.mubr.f32.mxu1 %v1338_v0  ;;  %v113_v2 = vld [vmem:[#allocation5 + $0x28] sm:$0xff]  ;;  %v112_v5 = vld [vmem:[#allocation5 + $0x20] sm:$0xff]  ;;  %v111_v48 = vld [vmem:[#allocation5 + $0x18] sm:$0xff] }
  0x4d   :  { %v962_v4 = vpack.c.bf16 %v113_v2, %v109_v1  ;;  %v117_v6 = vld [vmem:[#allocation5 + $0x48] sm:$0xff]  ;;  %v964_v8 = vpack.c.bf16 %v112_v5, %v108_v3  ;;  %v116_v10 = vld [vmem:[#allocation5 + $0x40] sm:$0xff]  ;;  %v115_v49 = vld [vmem:[#allocation5 + $0x38] sm:$0xff] }
  0x4e   :  { %v121_v7 = vld [vmem:[#allocation5 + $0x68] sm:$0xff]  ;;  %v120_v11 = vld [vmem:[#allocation5 + $0x60] sm:$0xff]  ;;  %v994_v51 = vpack.c.bf16 %v115_v49, %v111_v48  ;;  %v110_v52 = vld [vmem:[#allocation5 + $0x10] sm:$0xff] }
  0x4f   :  { %v966_v9 = vpack.c.bf16 %v121_v7, %v117_v6  ;;  %v125_v12 = vld [vmem:[#allocation5 + $0x88] sm:$0xff]  ;;  %963 = vmatprep.subr.bf16.mxu1 %v962_v4  ;;  %v968_v14 = vpack.c.bf16 %v120_v11, %v116_v10  ;;  %v124_v16 = vld [vmem:[#allocation5 + $0x80] sm:$0xff]  ;;  %v114_v53 = vld [vmem:[#allocation5 + $0x30] sm:$0xff] }
  0x50   :  { %v129_v13 = vld [vmem:[#allocation5 + $0xa8] sm:$0xff]  ;;  %965 = vmatpush1.bf16.msra.mxu1 %v964_v8  ;;  %v128_v17 = vld [vmem:[#allocation5 + $0xa0] sm:$0xff]  ;;  %v119_v54 = vld [vmem:[#allocation5 + $0x58] sm:$0xff]  ;;  %v996_v57 = vpack.c.bf16 %v114_v53, %v110_v52 }
  0x51   :  { %967 = vmatprep.subr.bf16.mxu1 %v966_v9  ;;  %v970_v15 = vpack.c.bf16 %v129_v13, %v125_v12  ;;  %v133_v18 = vld [vmem:[#allocation5 + $0xc8] sm:$0xff]  ;;  %v972_v20 = vpack.c.bf16 %v128_v17, %v124_v16  ;;  %v132_v22 = vld [vmem:[#allocation5 + $0xc0] sm:$0xff]  ;;  %v123_v55 = vld [vmem:[#allocation5 + $0x78] sm:$0xff] }
  0x52   :  { %v137_v19 = vld [vmem:[#allocation5 + $0xe8] sm:$0xff]  ;;  %v136_v23 = vld [vmem:[#allocation5 + $0xe0] sm:$0xff]  ;;  %v107_v56 = vld [vmem:[#allocation2] sm:$0xff]  ;;  %v998_v58 = vpack.c.bf16 %v123_v55, %v119_v54 }
  0x53   :  { %v974_v21 = vpack.c.bf16 %v137_v19, %v133_v18  ;;  %v141_v24 = vld [vmem:[#allocation5 + $0x108] sm:$0xff]  ;;  %v976_v26 = vpack.c.bf16 %v136_v23, %v132_v22  ;;  %v140_v28 = vld [vmem:[#allocation5 + $0x100] sm:$0xff]  ;;  %v118_v59 = vld [vmem:[#allocation5 + $0x50] sm:$0xff] }
  0x54   :  { %969 = vmatpush1.bf16.msra.mxu1 %v968_v14  ;;  %v145_v25 = vld [vmem:[#allocation5 + $0x128] sm:$0xff]  ;;  %v144_v29 = vld [vmem:[#allocation5 + $0x120] sm:$0xff]  ;;  %v122_v60 = vld [vmem:[#allocation5 + $0x70] sm:$0xff] }
  0x55   :  { %971 = vmatprep.subr.bf16.mxu1 %v970_v15  ;;  %v978_v27 = vpack.c.bf16 %v145_v25, %v141_v24  ;;  %v149_v30 = vld [vmem:[#allocation5 + $0x148] sm:$0xff]  ;;  %v980_v32 = vpack.c.bf16 %v144_v29, %v140_v28  ;;  %v148_v34 = vld [vmem:[#allocation5 + $0x140] sm:$0xff]  ;;  %v127_v61 = vld [vmem:[#allocation5 + $0x98] sm:$0xff]  ;;  %v1000_v63 = vpack.c.bf16 %v122_v60, %v118_v59 }
  0x56   :  { %v153_v31 = vld [vmem:[#allocation5 + $0x168] sm:$0xff]  ;;  %v152_v35 = vld [vmem:[#allocation5 + $0x160] sm:$0xff]  ;;  %v131_v62 = vld [vmem:[#allocation5 + $0xb8] sm:$0xff] }
  0x57   :  { %v982_v33 = vpack.c.bf16 %v153_v31, %v149_v30  ;;  %v157_v36 = vld [vmem:[#allocation5 + $0x188] sm:$0xff]  ;;  %v984_v38 = vpack.c.bf16 %v152_v35, %v148_v34  ;;  %v156_v40 = vld [vmem:[#allocation5 + $0x180] sm:$0xff]  ;;  %v1002_v1 = vpack.c.bf16 %v131_v62, %v127_v61  ;;  %v126_v2 = vld [vmem:[#allocation5 + $0x90] sm:$0xff] }
  0x58   :  { %973 = vmatpush1.bf16.msra.mxu1 %v972_v20  ;;  %v161_v37 = vld [vmem:[#allocation5 + $0x1a8] sm:$0xff]  ;;  %v160_v41 = vld [vmem:[#allocation5 + $0x1a0] sm:$0xff]  ;;  %v130_v3 = vld [vmem:[#allocation5 + $0xb0] sm:$0xff] }
  0x59   :  { %975 = vmatprep.subr.bf16.mxu1 %v974_v21  ;;  %v986_v39 = vpack.c.bf16 %v161_v37, %v157_v36  ;;  %v165_v42 = vld [vmem:[#allocation5 + $0x1c8] sm:$0xff]  ;;  %v988_v44 = vpack.c.bf16 %v160_v41, %v156_v40  ;;  %v164_v46 = vld [vmem:[#allocation5 + $0x1c0] sm:$0xff]  ;;  %v135_v4 = vld [vmem:[#allocation5 + $0xd8] sm:$0xff]  ;;  %v1004_v6 = vpack.c.bf16 %v130_v3, %v126_v2 }
  0x5a   :  { %v169_v43 = vld [vmem:[#allocation5 + $0x1e8] sm:$0xff]  ;;  %v168_v47 = vld [vmem:[#allocation5 + $0x1e0] sm:$0xff]  ;;  %v139_v5 = vld [vmem:[#allocation5 + $0xf8] sm:$0xff] }
  0x5b   :  { %v990_v45 = vpack.c.bf16 %v169_v43, %v165_v42  ;;  %v992_v50 = vpack.c.bf16 %v168_v47, %v164_v46  ;;  %v1006_v7 = vpack.c.bf16 %v139_v5, %v135_v4  ;;  %v134_v8 = vld [vmem:[#allocation5 + $0xd0] sm:$0xff]  ;;  %v143_v10 = vld [vmem:[#allocation5 + $0x118] sm:$0xff]  ;;  %v422_v34 = vld [vmem:[#allocation7 + $0x8] sm:$0xff] }
  0x5c   :  { %977 = vmatpush1.bf16.msra.mxu1 %v976_v26  ;;  %v138_v9 = vld [vmem:[#allocation5 + $0xf0] sm:$0xff]  ;;  %v147_v11 = vld [vmem:[#allocation5 + $0x138] sm:$0xff]  ;;  %v421_v36 = vld [vmem:[#allocation7] sm:$0xff] }
  0x5d   :  { %979 = vmatprep.subr.bf16.mxu1 %v978_v27  ;;  %v1008_v12 = vpack.c.bf16 %v138_v9, %v134_v8  ;;  %v1010_v13 = vpack.c.bf16 %v147_v11, %v143_v10  ;;  %v142_v14 = vld [vmem:[#allocation5 + $0x110] sm:$0xff]  ;;  %v151_v15 = vld [vmem:[#allocation5 + $0x158] sm:$0xff]  ;;  %v425_v43 = vld [vmem:[#allocation7 + $0x20] sm:$0xff] }
  0x5e   :  { %v155_v16 = vld [vmem:[#allocation5 + $0x178] sm:$0xff]  ;;  %v150_v19 = vld [vmem:[#allocation5 + $0x150] sm:$0xff]  ;;  %v429_v49 = vld [vmem:[#allocation7 + $0x40] sm:$0xff] }
  0x5f   :  { %v1014_v18 = vpack.c.bf16 %v155_v16, %v151_v15  ;;  %v154_v20 = vld [vmem:[#allocation5 + $0x170] sm:$0xff]  ;;  %v159_v21 = vld [vmem:[#allocation5 + $0x198] sm:$0xff]  ;;  %v433_v55 = vld [vmem:[#allocation7 + $0x60] sm:$0xff] }
  0x60   :  { %981 = vmatpush1.bf16.msra.mxu1 %v980_v32  ;;  %v163_v22 = vld [vmem:[#allocation5 + $0x1b8] sm:$0xff]  ;;  %v1016_v23 = vpack.c.bf16 %v154_v20, %v150_v19  ;;  %v158_v25 = vld [vmem:[#allocation5 + $0x190] sm:$0xff]  ;;  %v437_v61 = vld [vmem:[#allocation7 + $0x80] sm:$0xff] }
  0x61   :  { %983 = vmatprep.subr.bf16.mxu1 %v982_v33  ;;  %v1018_v24 = vpack.c.bf16 %v163_v22, %v159_v21  ;;  %v162_v26 = vld [vmem:[#allocation5 + $0x1b0] sm:$0xff]  ;;  %v167_v27 = vld [vmem:[#allocation5 + $0x1d8] sm:$0xff]  ;;  %v441_v4 = vld [vmem:[#allocation7 + $0xa0] sm:$0xff] }
  0x62   :  { %v171_v28 = vld [vmem:[#allocation5 + $0x1f8] sm:$0xff]  ;;  %v1020_v29 = vpack.c.bf16 %v162_v26, %v158_v25  ;;  %v166_v31 = vld [vmem:[#allocation5 + $0x1d0] sm:$0xff]  ;;  %v445_v10 = vld [vmem:[#allocation7 + $0xc0] sm:$0xff] }
  0x63   :  { %v1022_v30 = vpack.c.bf16 %v171_v28, %v167_v27  ;;  %v170_v32 = vld [vmem:[#allocation5 + $0x1f0] sm:$0xff]  ;;  %v424_v35 = vld [vmem:[#allocation7 + $0x18] sm:$0xff]  ;;  %v449_v15 = vld [vmem:[#allocation7 + $0xe0] sm:$0xff] }
  0x64   :  { %985 = vmatpush1.bf16.msra.mxu1 %v984_v38  ;;  %v1024_v33 = vpack.c.bf16 %v170_v32, %v166_v31  ;;  %v1026_v37 = vpack.c.bf16 %v424_v35, %v422_v34  ;;  %v423_v38 = vld [vmem:[#allocation7 + $0x10] sm:$0xff]  ;;  %v428_v40 = vld [vmem:[#allocation7 + $0x38] sm:$0xff] }
  0x65   :  { %987 = vmatprep.subr.bf16.mxu1 %v986_v39  ;;  %v426_v39 = vld [vmem:[#allocation7 + $0x28] sm:$0xff]  ;;  %v1028_v41 = vpack.c.bf16 %v423_v38, %v421_v36  ;;  %v432_v46 = vld [vmem:[#allocation7 + $0x58] sm:$0xff]  ;;  %v439_v62 = vld [vmem:[#allocation7 + $0x90] sm:$0xff] }
  0x66   :  { %v1030_v42 = vpack.c.bf16 %v428_v40, %v426_v39  ;;  %1027 = vmatprep.subr.bf16.mxu0 %v1026_v37  ;;  %v436_v52 = vld [vmem:[#allocation7 + $0x78] sm:$0xff]  ;;  %v1044_v2 = vpack.c.bf16 %v439_v62, %v437_v61  ;;  %v443_v5 = vld [vmem:[#allocation7 + $0xb0] sm:$0xff]  ;;  %v461_v62 = vld [vmem:[#allocation7 + $0x140] sm:$0xff] }
  0x67   :  { %1029 = vmatpush1.bf16.msra.mxu0 %v1028_v41  ;;  %v1048_v8 = vpack.c.bf16 %v443_v5, %v441_v4  ;;  %v447_v11 = vld [vmem:[#allocation7 + $0xd0] sm:$0xff]  ;;  %v172_v27 = vld [vmem:[%s1567_s2] sm:$0xf]  ;;  %v465_v5 = vld [vmem:[#allocation7 + $0x160] sm:$0xff] }
  0x68   :  { %989 = vmatpush1.bf16.msra.mxu1 %v988_v44  ;;  %v427_v44 = vld [vmem:[#allocation7 + $0x30] sm:$0xff]  ;;  %1031 = vmatprep.subr.bf16.mxu0 %v1030_v42 }
  0x69   :  { %991 = vmatprep.subr.bf16.mxu1 %v990_v45  ;;  %v430_v45 = vld [vmem:[#allocation7 + $0x48] sm:$0xff]  ;;  %v1032_v47 = vpack.c.bf16 %v427_v44, %v425_v43  ;;  %v451_v16 = vld [vmem:[#allocation7 + $0xf0] sm:$0xff] }
  0x6a   :  { %v1034_v48 = vpack.c.bf16 %v432_v46, %v430_v45  ;;  %v1056_v19 = vpack.c.bf16 %v451_v16, %v449_v15  ;;  %v473_v16 = vld [vmem:[#allocation7 + $0x1a0] sm:$0xff] }
  0x6b   :  { %1033 = vmatpush1.bf16.msra.mxu0 %v1032_v47 }
  0x6c   :  { %993 = vmatpush1.bf16.msra.mxu1 %v992_v50  ;;  %v431_v50 = vld [vmem:[#allocation7 + $0x50] sm:$0xff]  ;;  %1035 = vmatprep.subr.bf16.mxu0 %v1034_v48 }
  0x6d   :  { %995 = vmatprep.subr.bf16.mxu1 %v994_v51  ;;  %v434_v51 = vld [vmem:[#allocation7 + $0x68] sm:$0xff]  ;;  %v1036_v53 = vpack.c.bf16 %v431_v50, %v429_v49  ;;  %v453_v50 = vld [vmem:[#allocation7 + $0x100] sm:$0xff] }
  0x6e   :  { %v1038_v54 = vpack.c.bf16 %v436_v52, %v434_v51  ;;  %v455_v51 = vld [vmem:[#allocation7 + $0x110] sm:$0xff] }
  0x6f   :  { %259 = vmatmul.mubr.f32.vlgmr.msra.gmra.mrb[0].mxu1 %v107_v56  ;;  %1037 = vmatpush1.bf16.msra.mxu0 %v1036_v53  ;;  %v1060_v52 = vpack.c.bf16 %v455_v51, %v453_v50  ;;  %v458_v53 = vld [vmem:[#allocation7 + $0x128] sm:$0xff]  ;;  %v336_v50 = vld [vmem:[%s1568_s3] sm:$0xf] }
  0x70   :  { %997 = vmatpush1.bf16.msra.mxu1 %v996_v57  ;;  %329 = vmatprep.mubr.f32.mxu1 %v1338_v0  ;;  %v146_v0 = vld [vmem:[#allocation5 + $0x130] sm:$0xff]  ;;  %v438_v57 = vld [vmem:[#allocation7 + $0x88] sm:$0xff]  ;;  %v337_v51 = vld [vmem:[%s1569_s4] sm:$0xf] }
  0x71   :  { %999 = vmatprep.subr.bf16.mxu1 %v998_v58  ;;  %v1012_v17 = vpack.c.bf16 %v146_v0, %v142_v14  ;;  %v440_v58 = vld [vmem:[#allocation7 + $0x98] sm:$0xff]  ;;  %1039 = vmatprep.subr.bf16.mxu0 %v1038_v54  ;;  %v1052_v14 = vpack.c.bf16 %v447_v11, %v445_v10  ;;  %v469_v10 = vld [vmem:[#allocation7 + $0x180] sm:$0xff] }
  0x72   :  { %v1042_v60 = vpack.c.bf16 %v440_v58, %v438_v57  ;;  %v460_v54 = vld [vmem:[#allocation7 + $0x138] sm:$0xff]  ;;  %v459_v57 = vld [vmem:[#allocation7 + $0x130] sm:$0xff] }
  0x74   :  { %1001 = vmatpush1.bf16.msra.mxu1 %v1000_v63  ;;  %v442_v63 = vld [vmem:[#allocation7 + $0xa8] sm:$0xff] }
  0x75   :  { %1003 = vmatprep.subr.bf16.mxu1 %v1002_v1  ;;  %v444_v1 = vld [vmem:[#allocation7 + $0xb8] sm:$0xff] }
  0x76   :  { %v1046_v3 = vpack.c.bf16 %v444_v1, %v442_v63  ;;  %v463_v63 = vld [vmem:[#allocation7 + $0x150] sm:$0xff] }
  0x77   :  { %v1068_v1 = vpack.c.bf16 %v463_v63, %v461_v62 }
  0x78   :  { %1005 = vmatpush1.bf16.msra.mxu1 %v1004_v6  ;;  %v446_v6 = vld [vmem:[#allocation7 + $0xc8] sm:$0xff] }
  0x79   :  { %1007 = vmatprep.subr.bf16.mxu1 %v1006_v7  ;;  %v448_v7 = vld [vmem:[#allocation7 + $0xd8] sm:$0xff] }
  0x7a   :  { %v1050_v9 = vpack.c.bf16 %v448_v7, %v446_v6  ;;  %v467_v6 = vld [vmem:[#allocation7 + $0x170] sm:$0xff] }
  0x7b   :  { %v1072_v7 = vpack.c.bf16 %v467_v6, %v465_v5 }
  0x7c   :  { %1009 = vmatpush1.bf16.msra.mxu1 %v1008_v12  ;;  %v450_v12 = vld [vmem:[#allocation7 + $0xe8] sm:$0xff] }
  0x7d   :  { %1011 = vmatprep.subr.bf16.mxu1 %v1010_v13  ;;  %v452_v13 = vld [vmem:[#allocation7 + $0xf8] sm:$0xff] }
  0x7e   :  { %v1054_v0 = vpack.c.bf16 %v452_v13, %v450_v12  ;;  %v471_v12 = vld [vmem:[#allocation7 + $0x190] sm:$0xff]  ;;  %v474_v13 = vld [vmem:[#allocation7 + $0x1a8] sm:$0xff] }
  0x80   :  { %1013 = vmatpush1.bf16.msra.mxu1 %v1012_v17  ;;  %v454_v17 = vld [vmem:[#allocation7 + $0x108] sm:$0xff] }
  0x81   :  { %1015 = vmatprep.subr.bf16.mxu1 %v1014_v18  ;;  %v456_v18 = vld [vmem:[#allocation7 + $0x118] sm:$0xff] }
  0x82   :  { %v1058_v20 = vpack.c.bf16 %v456_v18, %v454_v17  ;;  %v475_v17 = vld [vmem:[#allocation7 + $0x1b0] sm:$0xff]  ;;  %v478_v18 = vld [vmem:[#allocation7 + $0x1c8] sm:$0xff] }
  0x84   :  { %1017 = vmatpush1.bf16.msra.mxu1 %v1016_v23  ;;  %v174_v23 = vlaneseq }
  0x85   :  { %1019 = vmatprep.subr.bf16.mxu1 %v1018_v24 }
  0x86   :  { %v175_v24 = vshrl.u32 %v174_v23, 7  ;;  %v479_v23 = vld [vmem:[#allocation7 + $0x1d0] sm:$0xff] }
  0x88   :  { %1021 = vmatpush1.bf16.msra.mxu1 %v1020_v29  ;;  %v1461_v25 = vsub.s32 0, %v175_v24  ;;  %v1463_v26 = vsub.s32 1, %v175_v24  ;;  %v1472_v31 = vsub.s32 3, %v175_v24 }
  0x89   :  { %1023 = vmatprep.subr.bf16.mxu1 %v1022_v30  ;;  %v1470_v30 = vsub.s32 2, %v175_v24  ;;  %v482_v24 = vld [vmem:[#allocation7 + $0x1e8] sm:$0xff] }
  0x8a   :  { %v177_v28 = vrot.slane %v172_v27, %v1461_v25  ;;  %v181_v29 = vrot.slane %v172_v27, %v1463_v26  ;;  %v189_v35 = vrot.slane %v172_v27, %v1472_v31  ;;  %v396_v62 = vrot.slane %v337_v51, %v1461_v25 }
  0x8b   :  { %v185_v34 = vrot.slane %v172_v27, %v1470_v30  ;;  %v484_v27 = vld [vmem:[#allocation7 + $0x1f8] sm:$0xff]  ;;  %v408_v63 = vrot.slane %v337_v51, %v1472_v31 }
  0x8c   :  { %1025 = vmatpush1.bf16.msra.mxu1 %v1024_v33 }
  0x8f   :  { %330 = vmatmul.mubr.f32.vlgmr.msra.gmra.mrb[2].mxu1 %v107_v56  ;;  %v435_v56 = vld [vmem:[#allocation7 + $0x70] sm:$0xff] }
  0x90   :  { %v1040_v59 = vpack.c.bf16 %v435_v56, %v433_v55  ;;  %v1062_v55 = vpack.c.bf16 %v460_v54, %v458_v53  ;;  %v457_v56 = vld [vmem:[#allocation7 + $0x120] sm:$0xff]  ;;  %v371_v53 = vrot.slane %v336_v50, %v1461_v25  ;;  %v383_v54 = vrot.slane %v336_v50, %v1472_v31 }
  0x91   :  { %v1064_v58 = vpack.c.bf16 %v459_v57, %v457_v56 }
  0x92   :  { %1041 = vmatpush1.bf16.msra.mxu0 %v1040_v59  ;;  %v462_v59 = vld [vmem:[#allocation7 + $0x148] sm:$0xff] }
  0x93   :  { %1043 = vmatprep.subr.bf16.mxu0 %v1042_v60  ;;  %v464_v60 = vld [vmem:[#allocation7 + $0x158] sm:$0xff] }
  0x94   :  { %v1066_v61 = vpack.c.bf16 %v464_v60, %v462_v59 }
  0x96   :  { %1045 = vmatpush1.bf16.msra.mxu0 %v1044_v2  ;;  %v466_v2 = vld [vmem:[#allocation7 + $0x168] sm:$0xff] }
  0x97   :  { %1047 = vmatprep.subr.bf16.mxu0 %v1046_v3  ;;  %v468_v3 = vld [vmem:[#allocation7 + $0x178] sm:$0xff] }
  0x98   :  { %v1070_v4 = vpack.c.bf16 %v468_v3, %v466_v2 }
  0x9a   :  { %1049 = vmatpush1.bf16.msra.mxu0 %v1048_v8  ;;  %v470_v8 = vld [vmem:[#allocation7 + $0x188] sm:$0xff] }
  0x9b   :  { %1051 = vmatprep.subr.bf16.mxu0 %v1050_v9  ;;  %v472_v9 = vld [vmem:[#allocation7 + $0x198] sm:$0xff] }
  0x9c   :  { %v1074_v11 = vpack.c.bf16 %v472_v9, %v470_v8  ;;  %v487_v8 = vld [vmem:[#allocation7 + $0x210] sm:$0xff] }
  0x9e   :  { %1053 = vmatpush1.bf16.msra.mxu0 %v1052_v14  ;;  %v476_v14 = vld [vmem:[#allocation7 + $0x1b8] sm:$0xff] }
  0x9f   :  { %1055 = vmatprep.subr.bf16.mxu0 %v1054_v0  ;;  %v1076_v0 = vpack.c.bf16 %v471_v12, %v469_v10  ;;  %v1078_v15 = vpack.c.bf16 %v476_v14, %v474_v13  ;;  %v492_v12 = vld [vmem:[#allocation7 + $0x238] sm:$0xff] }
  0xa2   :  { %1057 = vmatpush1.bf16.msra.mxu0 %v1056_v19  ;;  %v480_v19 = vld [vmem:[#allocation7 + $0x1d8] sm:$0xff] }
  0xa3   :  { %1059 = vmatprep.subr.bf16.mxu0 %v1058_v20  ;;  %v1080_v20 = vpack.c.bf16 %v475_v17, %v473_v16  ;;  %v491_v16 = vld [vmem:[#allocation7 + $0x230] sm:$0xff] }
  0xa6   :  { %1061 = vmatpush1.bf16.msra.mxu0 %v1060_v52  ;;  %v375_v52 = vrot.slane %v336_v50, %v1463_v26 }
  0xa7   :  { %1063 = vmatprep.subr.bf16.mxu0 %v1062_v55  ;;  %v379_v55 = vrot.slane %v336_v50, %v1470_v30  ;;  %v510_v50 = vld [vmem:[#allocation7 + $0x2c8] sm:$0xff] }
  0xaa   :  { %1065 = vmatpush1.bf16.msra.mxu0 %v1064_v58 }
  0xab   :  { %1067 = vmatprep.subr.bf16.mxu0 %v1066_v61  ;;  %v400_v61 = vrot.slane %v337_v51, %v1463_v26 }
  0xae   :  { %1069 = vmatpush1.bf16.msra.mxu0 %v1068_v1  ;;  %v404_v1 = vrot.slane %v337_v51, %v1470_v30  ;;  %v512_v51 = vld [vmem:[#allocation7 + $0x2d8] sm:$0xff] }
  0xaf   :  { %1071 = vmatprep.subr.bf16.mxu0 %v1070_v4 }
  0xb2   :  { %1073 = vmatpush1.bf16.msra.mxu0 %v1072_v7 }
  0xb3   :  { %1075 = vmatprep.subr.bf16.mxu0 %v1074_v11  ;;  %v490_v11 = vld [vmem:[#allocation7 + $0x228] sm:$0xff] }
  0xb6   :  { %1077 = vmatpush1.bf16.msra.mxu0 %v1076_v0  ;;  %v1094_v0 = vpack.c.bf16 %v492_v12, %v490_v11  ;;  %v525_v11 = vld [vmem:[#allocation7 + $0x340] sm:$0xff]  ;;  %v527_v12 = vld [vmem:[#allocation7 + $0x350] sm:$0xff] }
  0xb7   :  { %1079 = vmatprep.subr.bf16.mxu0 %v1078_v15  ;;  %v489_v15 = vld [vmem:[#allocation7 + $0x220] sm:$0xff] }
  0xba   :  { %1081 = vmatpush1.bf16.msra.mxu0 %v1080_v20  ;;  %v1096_v20 = vpack.c.bf16 %v491_v16, %v489_v15  ;;  %v529_v15 = vld [vmem:[#allocation7 + $0x360] sm:$0xff]  ;;  %v531_v16 = vld [vmem:[#allocation7 + $0x370] sm:$0xff] }
 0x142   :  { %v260_v21 = vpop.f32.mrb[0].mxu1 }
 0x143   :  { %v262_v22 = vpop.f32.mrb[1].mxu1  ;;  %v1474_v32 = vadd.f32 %v260_v21, %v177_v28  ;;  %v1082_v21 = vpack.c.bf16 %v480_v19, %v478_v18  ;;  %v494_v18 = vld [vmem:[#allocation7 + $0x248] sm:$0xff]  ;;  %v496_v19 = vld [vmem:[#allocation7 + $0x258] sm:$0xff] }
 0x144   :  { %v1476_v33 = vadd.f32 %v262_v22, %v181_v29  ;;  %v477_v22 = vld [vmem:[#allocation7 + $0x1c0] sm:$0xff]  ;;  %v1086_v29 = vpack.c.bf16 %v484_v27, %v482_v24  ;;  %v498_v24 = vld [vmem:[#allocation7 + $0x268] sm:$0xff]  ;;  %v500_v27 = vld [vmem:[#allocation7 + $0x278] sm:$0xff] }
 0x145   :  { %v343_v36 = vmul.f32 %v1474_v32, %v1474_v32  ;;  %v1084_v28 = vpack.c.bf16 %v479_v23, %v477_v22  ;;  %1083 = vmatprep.subr.bf16.mxu0 %v1082_v21  ;;  %v1098_v21 = vpack.c.bf16 %v496_v19, %v494_v18  ;;  %v493_v22 = vld [vmem:[#allocation7 + $0x240] sm:$0xff]  ;;  %v495_v23 = vld [vmem:[#allocation7 + $0x250] sm:$0xff]  ;;  %v536_v18 = vld [vmem:[#allocation7 + $0x398] sm:$0xff]  ;;  %v1136_v19 = vpack.c.bf16 %v531_v16, %v529_v15 }
 0x146   :  { %v344_v37 = vmul.f32 %v1476_v33, %v1476_v33  ;;  %v338_v41 = vadd.f32 %v1476_v33, %v1474_v32  ;;  %v776_v16 = vld [vmem:[#allocation8 + $0xc0] sm:$0xff] }
 0x147   :  { %1085 = vmatpush1.bf16.msra.mxu0 %v1084_v28  ;;  %v1100_v28 = vpack.c.bf16 %v495_v23, %v493_v22  ;;  %v535_v22 = vld [vmem:[#allocation7 + $0x390] sm:$0xff]  ;;  %v538_v23 = vld [vmem:[#allocation7 + $0x3a8] sm:$0xff] }
 0x148   :  { %v347_v45 = vadd.f32 %v344_v37, %v343_v36  ;;  %1087 = vmatprep.subr.bf16.mxu0 %v1086_v29  ;;  %v486_v37 = vld [vmem:[#allocation7 + $0x208] sm:$0xff]  ;;  %v1102_v29 = vpack.c.bf16 %v500_v27, %v498_v24  ;;  %v540_v24 = vld [vmem:[#allocation7 + $0x3b8] sm:$0xff] }
 0x162   :  { %v331_v38 = vpop.f32.mrb[2].mxu1 }
 0x163   :  { %v1484_v39 = vadd.f32 %v331_v38, %v185_v34  ;;  %v333_v40 = vpop.f32.mrb[3].mxu1  ;;  %v481_v34 = vld [vmem:[#allocation7 + $0x1e0] sm:$0xff]  ;;  %v488_v38 = vld [vmem:[#allocation7 + $0x218] sm:$0xff] }
 0x164   :  { %v1488_v42 = vadd.f32 %v333_v40, %v189_v35  ;;  %v483_v35 = vld [vmem:[#allocation7 + $0x1f0] sm:$0xff]  ;;  %v1090_v40 = vpack.c.bf16 %v488_v38, %v486_v37  ;;  %v504_v37 = vld [vmem:[#allocation7 + $0x298] sm:$0xff] }
 0x165   :  { %v345_v43 = vmul.f32 %v1484_v39, %v1484_v39  ;;  %v339_v44 = vadd.f32 %v338_v41, %v1484_v39  ;;  %v1088_v36 = vpack.c.bf16 %v483_v35, %v481_v34  ;;  %v497_v34 = vld [vmem:[#allocation7 + $0x260] sm:$0xff]  ;;  %v499_v35 = vld [vmem:[#allocation7 + $0x270] sm:$0xff] }
 0x166   :  { %v346_v47 = vmul.f32 %v1488_v42, %v1488_v42  ;;  %v1104_v38 = vpack.c.bf16 %v499_v35, %v497_v34  ;;  %v539_v34 = vld [vmem:[#allocation7 + $0x3b0] sm:$0xff]  ;;  %v542_v35 = vld [vmem:[#allocation7 + $0x3c8] sm:$0xff] }
 0x167   :  { %v340_v46 = vadd.f32 %v339_v44, %v1488_v42  ;;  %v348_v48 = vadd.f32 %v347_v45, %v345_v43  ;;  %1089 = vmatpush1.bf16.msra.mxu0 %v1088_v36  ;;  %v502_v36 = vld [vmem:[#allocation7 + $0x288] sm:$0xff] }
 0x168   :  { %1091 = vmatprep.subr.bf16.mxu0 %v1090_v40  ;;  %v1106_v40 = vpack.c.bf16 %v504_v37, %v502_v36  ;;  %v544_v36 = vld [vmem:[#allocation7 + $0x3d8] sm:$0xff] }
 0x169   :  { %341 = vadd.xlane.f32.xlu0 %v340_v46  ;;  %v349_v49 = vadd.f32 %v348_v48, %v346_v47 }
 0x16d   :  { %350 = vadd.xlane.f32.xlu0 %v349_v49 }
 0x1f6   :  { %v342_v41 = vpop.xlane.xlu0 %341 }
 0x1f7   :  { %v352_v43 = vmul.f32 0.001953125, %v342_v41  ;;  %v501_v41 = vld [vmem:[#allocation7 + $0x280] sm:$0xff] }
 0x1f9   :  { %v354_v45 = vmul.f32 %v352_v43, %v352_v43  ;;  %v361_v56 = vsub.f32 %v1484_v39, %v352_v43  ;;  %v360_v57 = vsub.f32 %v1476_v33, %v352_v43  ;;  %v359_v58 = vsub.f32 %v1474_v32, %v352_v43  ;;  %v485_v32 = vld [vmem:[#allocation7 + $0x200] sm:$0xff] }
 0x1fa   :  { %v351_v44 = vpop.xlane.xlu0 %350  ;;  %v362_v59 = vsub.f32 %v1488_v42, %v352_v43  ;;  %v1092_v30 = vpack.c.bf16 %v487_v8, %v485_v32  ;;  %v503_v43 = vld [vmem:[#allocation7 + $0x290] sm:$0xff]  ;;  %v526_v8 = vld [vmem:[#allocation7 + $0x348] sm:$0xff] }
 0x1fb   :  { %v353_v46 = vmul.f32 0.001953125, %v351_v44  ;;  %v506_v44 = vld [vmem:[#allocation7 + $0x2a8] sm:$0xff]  ;;  %v523_v32 = vld [vmem:[#allocation7 + $0x330] sm:$0xff] }
 0x1fd   :  { %v355_v47 = vsub.f32 %v353_v46, %v354_v45  ;;  %v508_v45 = vld [vmem:[#allocation7 + $0x2b8] sm:$0xff]  ;;  %v1108_v46 = vpack.c.bf16 %v503_v43, %v501_v41  ;;  %v543_v41 = vld [vmem:[#allocation7 + $0x3d0] sm:$0xff]  ;;  %v546_v43 = vld [vmem:[#allocation7 + $0x3e8] sm:$0xff] }
 0x1ff   :  { %v356_v48 = vmax.f32 %v355_v47, 0.0  ;;  %v1110_v47 = vpack.c.bf16 %v508_v45, %v506_v44  ;;  %v548_v44 = vld [vmem:[#allocation7 + $0x3f8] sm:$0xff] }
 0x201   :  { %v357_v49 = vadd.f32 1e-05, %v356_v48  ;;  %v505_v48 = vld [vmem:[#allocation7 + $0x2a0] sm:$0xff] }
 0x203   :  { %1202 = vrsqrt.f32 %v357_v49  ;;  %v507_v49 = vld [vmem:[#allocation7 + $0x2b0] sm:$0xff] }
 0x20d   :  { %v1203_v60 = vpop.eup %1202 }
 0x20e   :  { %v364_v2 = vmul.f32 %v1203_v60, %v360_v57  ;;  %v363_v3 = vmul.f32 %v1203_v60, %v359_v58  ;;  %v366_v4 = vmul.f32 %v1203_v60, %v362_v59  ;;  %v365_v5 = vmul.f32 %v1203_v60, %v361_v56  ;;  %v514_v56 = vld [vmem:[#allocation7 + $0x2e8] sm:$0xff]  ;;  %v516_v57 = vld [vmem:[#allocation7 + $0x2f8] sm:$0xff]  ;;  %v513_v60 = vld [vmem:[#allocation7 + $0x2e0] sm:$0xff] }
 0x20f   :  { %v1118_v59 = vpack.c.bf16 %v516_v57, %v514_v56 }
 0x210   :  { %v389_v39 = vmul.f32 %v375_v52, %v364_v2  ;;  %v388_v6 = vmul.f32 %v371_v53, %v363_v3  ;;  %v391_v33 = vmul.f32 %v383_v54, %v366_v4  ;;  %v390_v7 = vmul.f32 %v379_v55, %v365_v5  ;;  %v509_v54 = vld [vmem:[#allocation7 + $0x2c0] sm:$0xff]  ;;  %v511_v55 = vld [vmem:[#allocation7 + $0x2d0] sm:$0xff]  ;;  %v522_v5 = vld [vmem:[#allocation7 + $0x328] sm:$0xff] }
 0x211   :  { %v1112_v52 = vpack.c.bf16 %v507_v49, %v505_v48  ;;  %v1114_v53 = vpack.c.bf16 %v512_v51, %v510_v50  ;;  %v1116_v58 = vpack.c.bf16 %v511_v55, %v509_v54  ;;  %v517_v3 = vld [vmem:[#allocation7 + $0x300] sm:$0xff]  ;;  %v519_v4 = vld [vmem:[#allocation7 + $0x310] sm:$0xff]  ;;  %v549_v51 = vld [vmem:[%s1571_s6] sm:$0x3] }
 0x212   :  { %v414_v42 = vadd.f32 %v400_v61, %v389_v39  ;;  %v413_v9 = vadd.f32 %v396_v62, %v388_v6  ;;  %v416_v10 = vadd.f32 %v408_v63, %v391_v33  ;;  %v1514_v13 = vadd.f32 %v404_v1, %v390_v7  ;;  %v515_v61 = vld [vmem:[#allocation7 + $0x2f0] sm:$0xff]  ;;  %v518_v62 = vld [vmem:[#allocation7 + $0x308] sm:$0xff]  ;;  %v520_v63 = vld [vmem:[#allocation7 + $0x318] sm:$0xff] }
 0x213   :  { %v1120_v1 = vpack.c.bf16 %v515_v61, %v513_v60  ;;  %v1122_v2 = vpack.c.bf16 %v520_v63, %v518_v62  ;;  %v524_v39 = vld [vmem:[#allocation7 + $0x338] sm:$0xff]  ;;  %v1124_v6 = vpack.c.bf16 %v519_v4, %v517_v3  ;;  %v521_v7 = vld [vmem:[#allocation7 + $0x320] sm:$0xff]  ;;  %v547_v48 = vld [vmem:[#allocation7 + $0x3f0] sm:$0xff] }
 0x214   :  { %v418_v31 = vmax.f32 %v414_v42, 0.0  ;;  %v417_v14 = vmax.f32 %v413_v9, 0.0  ;;  %v420_v17 = vmax.f32 %v416_v10, 0.0  ;;  %v1126_v33 = vpack.c.bf16 %v524_v39, %v522_v5  ;;  %v528_v42 = vld [vmem:[#allocation7 + $0x358] sm:$0xff]  ;;  %v768_v61 = vld [vmem:[#allocation8 + $0x80] sm:$0xff]  ;;  %v769_v62 = vld [vmem:[#allocation8 + $0x88] sm:$0xff] }
 0x215   :  { %v1128_v9 = vpack.c.bf16 %v523_v32, %v521_v7  ;;  %v1130_v10 = vpack.c.bf16 %v528_v42, %v526_v8  ;;  %v419_v50 = vmax.f32 %v1514_v13, 0.0  ;;  %v1154_v63 = vpack.c.bf16 %v769_v62, %v768_v61  ;;  %v770_v4 = vld [vmem:[#allocation8 + $0x90] sm:$0xff]  ;;  %v771_v5 = vld [vmem:[#allocation8 + $0x98] sm:$0xff]  ;;  %v772_v32 = vld [vmem:[#allocation8 + $0xa0] sm:$0xff] }
 0x216   :  { %625 = vmatprep.mubr.f32.mxu0 %v418_v31  ;;  %v530_v31 = vld [vmem:[#allocation7 + $0x368] sm:$0xff]  ;;  %v1158_v39 = vpack.c.bf16 %v771_v5, %v770_v4 }
 0x217   :  { %626 = vmatmul.mubr.f32.vlgmr.msra.gmra.mrb[0].mxu0 %v417_v14  ;;  %v532_v14 = vld [vmem:[#allocation7 + $0x378] sm:$0xff]  ;;  %1155 = vmatprep.subr.bf16.mxu1 %v1154_v63  ;;  %v773_v8 = vld [vmem:[#allocation8 + $0xa8] sm:$0xff] }
 0x218   :  { %1093 = vmatpush1.bf16.msra.mxu0 %v1092_v30  ;;  %696 = vmatprep.mubr.f32.mxu0 %v420_v17  ;;  %v1132_v30 = vpack.c.bf16 %v527_v12, %v525_v11  ;;  %v534_v17 = vld [vmem:[#allocation7 + $0x388] sm:$0xff]  ;;  %v1162_v42 = vpack.c.bf16 %v773_v8, %v772_v32  ;;  %v774_v12 = vld [vmem:[#allocation8 + $0xb0] sm:$0xff] }
 0x219   :  { %1095 = vmatprep.subr.bf16.mxu0 %v1094_v0  ;;  %v1134_v0 = vpack.c.bf16 %v532_v14, %v530_v31  ;;  %v775_v31 = vld [vmem:[#allocation8 + $0xb8] sm:$0xff] }
 0x21a   :  { %v1166_v14 = vpack.c.bf16 %v775_v31, %v774_v12 }
 0x21c   :  { %1097 = vmatpush1.bf16.msra.mxu0 %v1096_v20  ;;  %v1138_v20 = vpack.c.bf16 %v536_v18, %v534_v17  ;;  %v777_v17 = vld [vmem:[#allocation8 + $0xc8] sm:$0xff]  ;;  %v760_v18 = vld [vmem:[#allocation8 + $0x40] sm:$0xff] }
 0x21d   :  { %1099 = vmatprep.subr.bf16.mxu0 %v1098_v21  ;;  %v533_v21 = vld [vmem:[#allocation7 + $0x380] sm:$0xff] }
 0x21e   :  { %v1140_v27 = vpack.c.bf16 %v535_v22, %v533_v21  ;;  %v778_v21 = vld [vmem:[#allocation8 + $0xd0] sm:$0xff]  ;;  %v779_v22 = vld [vmem:[#allocation8 + $0xd8] sm:$0xff] }
 0x220   :  { %1101 = vmatpush1.bf16.msra.mxu0 %v1100_v28  ;;  %v1142_v28 = vpack.c.bf16 %v540_v24, %v538_v23  ;;  %v1174_v24 = vpack.c.bf16 %v779_v22, %v778_v21 }
 0x221   :  { %1103 = vmatprep.subr.bf16.mxu0 %v1102_v29  ;;  %v537_v29 = vld [vmem:[#allocation7 + $0x3a0] sm:$0xff] }
 0x222   :  { %v1144_v37 = vpack.c.bf16 %v539_v34, %v537_v29  ;;  %v780_v29 = vld [vmem:[#allocation8 + $0xe0] sm:$0xff]  ;;  %v781_v34 = vld [vmem:[#allocation8 + $0xe8] sm:$0xff] }
 0x224   :  { %1105 = vmatpush1.bf16.msra.mxu0 %v1104_v38  ;;  %v1146_v38 = vpack.c.bf16 %v544_v36, %v542_v35  ;;  %v1178_v36 = vpack.c.bf16 %v781_v34, %v780_v29  ;;  %v892_v34 = vld [vmem:[#allocation10] sm:$0x1] }
 0x225   :  { %1107 = vmatprep.subr.bf16.mxu0 %v1106_v40  ;;  %v541_v40 = vld [vmem:[#allocation7 + $0x3c0] sm:$0xff] }
 0x226   :  { %v1148_v45 = vpack.c.bf16 %v543_v41, %v541_v40  ;;  %v782_v40 = vld [vmem:[#allocation8 + $0xf0] sm:$0xff]  ;;  %v783_v41 = vld [vmem:[#allocation8 + $0xf8] sm:$0xff] }
 0x228   :  { %1109 = vmatpush1.bf16.msra.mxu0 %v1108_v46  ;;  %v1150_v46 = vpack.c.bf16 %v548_v44, %v546_v43  ;;  %v1182_v44 = vpack.c.bf16 %v783_v41, %v782_v40 }
 0x229   :  { %1111 = vmatprep.subr.bf16.mxu0 %v1110_v47  ;;  %v545_v47 = vld [vmem:[#allocation7 + $0x3e0] sm:$0xff] }
 0x22a   :  { %v1152_v49 = vpack.c.bf16 %v547_v48, %v545_v47 }
 0x22c   :  { %1113 = vmatpush1.bf16.msra.mxu0 %v1112_v52  ;;  %v554_v52 = vrot.slane %v549_v51, %v1461_v25 }
 0x22d   :  { %1115 = vmatprep.subr.bf16.mxu0 %v1114_v53  ;;  %v558_v53 = vrot.slane %v549_v51, %v1463_v26 }
 0x230   :  { %1117 = vmatpush1.bf16.msra.mxu0 %v1116_v58 }
 0x231   :  { %1119 = vmatprep.subr.bf16.mxu0 %v1118_v59 }
 0x234   :  { %1121 = vmatpush1.bf16.msra.mxu0 %v1120_v1  ;;  %v752_v1 = vld [vmem:[#allocation8] sm:$0xff] }
 0x235   :  { %1123 = vmatprep.subr.bf16.mxu0 %v1122_v2  ;;  %v753_v2 = vld [vmem:[#allocation8 + $0x8] sm:$0xff] }
 0x236   :  { %v1156_v3 = vpack.c.bf16 %v753_v2, %v752_v1 }
 0x238   :  { %1125 = vmatpush1.bf16.msra.mxu0 %v1124_v6  ;;  %1157 = vmatpush3.bf16.msra.mxu1 %v1156_v3  ;;  %v754_v6 = vld [vmem:[#allocation8 + $0x10] sm:$0xff] }
 0x239   :  { %1127 = vmatprep.subr.bf16.mxu0 %v1126_v33  ;;  %v755_v33 = vld [vmem:[#allocation8 + $0x18] sm:$0xff]  ;;  %1159 = vmatprep.subr.bf16.mxu1 %v1158_v39 }
 0x23a   :  { %v1160_v7 = vpack.c.bf16 %v755_v33, %v754_v6 }
 0x23c   :  { %1129 = vmatpush1.bf16.msra.mxu0 %v1128_v9  ;;  %1161 = vmatpush3.bf16.msra.mxu1 %v1160_v7  ;;  %v756_v9 = vld [vmem:[#allocation8 + $0x20] sm:$0xff] }
 0x23d   :  { %1131 = vmatprep.subr.bf16.mxu0 %v1130_v10  ;;  %v757_v10 = vld [vmem:[#allocation8 + $0x28] sm:$0xff]  ;;  %1163 = vmatprep.subr.bf16.mxu1 %v1162_v42 }
 0x23e   :  { %v1164_v11 = vpack.c.bf16 %v757_v10, %v756_v9 }
 0x240   :  { %1133 = vmatpush1.bf16.msra.mxu0 %v1132_v30  ;;  %1165 = vmatpush3.bf16.msra.mxu1 %v1164_v11  ;;  %v758_v30 = vld [vmem:[#allocation8 + $0x30] sm:$0xff] }
 0x241   :  { %1135 = vmatprep.subr.bf16.mxu0 %v1134_v0  ;;  %v759_v0 = vld [vmem:[#allocation8 + $0x38] sm:$0xff]  ;;  %1167 = vmatprep.subr.bf16.mxu1 %v1166_v14 }
 0x242   :  { %v1168_v15 = vpack.c.bf16 %v759_v0, %v758_v30 }
 0x244   :  { %1137 = vmatpush1.bf16.msra.mxu0 %v1136_v19  ;;  %1169 = vmatpush3.bf16.msra.mxu1 %v1168_v15  ;;  %v1170_v19 = vpack.c.bf16 %v777_v17, %v776_v16  ;;  %v925_v17 = vld [vmem:[%s1576_s11] ss:$0 sm:$0xff]  ;;  %s913_s11 = sshll.u32 %s1339_s26, 4  ;;  %s914_s11 = int_to_ptr.vmem [resolvable:$true] %s913_s11 }
 0x245   :  { %1139 = vmatprep.subr.bf16.mxu0 %v1138_v20  ;;  %v761_v20 = vld [vmem:[#allocation8 + $0x48] sm:$0xff]  ;;  %s1302_s17 = scalar_lea.vmem %s914_s11, 32  ;;  %p1303_p5 = scmp.lt.s32.totalorder %s914_s11, %s914_s11 }
 0x246   :  { %v1172_v23 = vpack.c.bf16 %v761_v20, %v760_v18  ;;  %1171 = vmatprep.subr.bf16.mxu1 %v1170_v19  ;;  %v926_v19 = vld [vmem:[%s1577_s12] ss:$0 sm:$0xff]  ;;  %s1298_s12 = scalar_lea.vmem %s914_s11, 16 }
 0x247   :  { %p1299_p4 = scmp.ne.s32.totalorder %s914_s11, %s1298_s12  ;;  %p1304_p6 = scmp.lt.s32.totalorder %s1302_s17, %s1298_s12 }
 0x248   :  { %1141 = vmatpush1.bf16.msra.mxu0 %v1140_v27  ;;  %v762_v27 = vld [vmem:[#allocation8 + $0x50] sm:$0xff]  ;;  %1173 = vmatpush3.bf16.msra.mxu1 %v1172_v23 }
 0x249   :  { %1143 = vmatprep.subr.bf16.mxu0 %v1142_v28  ;;  %v763_v28 = vld [vmem:[#allocation8 + $0x58] sm:$0xff]  ;;  %1175 = vmatprep.subr.bf16.mxu1 %v1174_v24  ;;  %p1305_p7 = por %p1304_p6, %p1303_p5 }
 0x24a   :  { %v1176_v35 = vpack.c.bf16 %v763_v28, %v762_v27 }
 0x24b   :  { %p1306_p8 = pnand %p1305_p7, %p1299_p4 }
 0x24c   :  { %1145 = vmatpush1.bf16.msra.mxu0 %v1144_v37  ;;  %v764_v37 = vld [vmem:[#allocation8 + $0x60] sm:$0xff]  ;;  %1177 = vmatpush3.bf16.msra.mxu1 %v1176_v35 }
 0x24d   :  { %1147 = vmatprep.subr.bf16.mxu0 %v1146_v38  ;;  %v765_v38 = vld [vmem:[#allocation8 + $0x68] sm:$0xff]  ;;  %1179 = vmatprep.subr.bf16.mxu1 %v1178_v36 }
 0x24e   :  { %v1180_v43 = vpack.c.bf16 %v765_v38, %v764_v37 }
 0x250   :  { %1149 = vmatpush1.bf16.msra.mxu0 %v1148_v45  ;;  %v766_v45 = vld [vmem:[#allocation8 + $0x70] sm:$0xff]  ;;  %1181 = vmatpush3.bf16.msra.mxu1 %v1180_v43 }
 0x251   :  { %1151 = vmatprep.subr.bf16.mxu0 %v1150_v46  ;;  %v767_v46 = vld [vmem:[#allocation8 + $0x78] sm:$0xff]  ;;  %1183 = vmatprep.subr.bf16.mxu1 %v1182_v44 }
 0x252   :  { %v1184_v47 = vpack.c.bf16 %v767_v46, %v766_v45 }
 0x254   :  { %1153 = vmatpush1.bf16.msra.mxu0 %v1152_v49  ;;  %1185 = vmatpush3.bf16.msra.mxu1 %v1184_v47 }
 0x257   :  { %697 = vmatmul.mubr.f32.vlgmr.msra.gmra.mrb[0].mxu0 %v419_v50 }
 0x32a   :  { %v698_v54 = vpop.f32.mrb[0].mxu0 }
 0x32b   :  { %v1522_v55 = vadd.f32 %v698_v54, %v554_v52  ;;  %v700_v56 = vpop.f32.mrb[1].mxu0 }
 0x32c   :  { %v1524_v57 = vadd.f32 %v700_v56, %v558_v53 }
 0x32d   :  { %v708_v13 = vmul.f32 %v1522_v55, %v1522_v55 }
 0x32e   :  { %v705_v58 = vadd.f32 %v1524_v57, %v1522_v55  ;;  %v709_v59 = vmul.f32 %v1524_v57, %v1524_v57 }
 0x330   :  { %706 = vadd.xlane.f32.xlu1 %v705_v58  ;;  %v710_v60 = vadd.f32 %v709_v59, %v708_v13  ;;  %v703_v58 = vld [vmem:[%s1572_s7] sm:$0x3] }
 0x331   :  { %v704_v13 = vld [vmem:[%s1573_s8] sm:$0x3]  ;;  %v728_v61 = vrot.slane %v703_v58, %v1461_v25  ;;  %v732_v62 = vrot.slane %v703_v58, %v1463_v26 }
 0x332   :  { %v741_v2 = vrot.slane %v704_v13, %v1461_v25  ;;  %v745_v3 = vrot.slane %v704_v13, %v1463_v26 }
 0x334   :  { %711 = vadd.xlane.f32.xlu1 %v710_v60 }
 0x3bd   :  { %v707_v48 = vpop.xlane.xlu1 %706 }
 0x3be   :  { %v713_v49 = vmul.f32 0.00390625, %v707_v48 }
 0x3c0   :  { %v715_v51 = vmul.f32 %v713_v49, %v713_v49  ;;  %v720_v59 = vsub.f32 %v1522_v55, %v713_v49  ;;  %v721_v60 = vsub.f32 %v1524_v57, %v713_v49  ;;  %v924_v57 = vld [vmem:[%s1575_s10] ss:$0 sm:$0xff] }
 0x3c1   :  { %v712_v50 = vpop.xlane.xlu1 %711 }
 0x3c2   :  { %v714_v52 = vmul.f32 0.00390625, %v712_v50 }
 0x3c4   :  { %v716_v53 = vsub.f32 %v714_v52, %v715_v51 }
 0x3c6   :  { %v717_v54 = vmax.f32 %v716_v53, 0.0 }
 0x3c8   :  { %v718_v56 = vadd.f32 1e-05, %v717_v54 }
 0x3ca   :  { %1204 = vrsqrt.f32 %v718_v56 }
 0x3d4   :  { %v1205_v63 = vpop.eup %1204 }
 0x3d5   :  { %v723_v1 = vmul.f32 %v1205_v63, %v721_v60  ;;  %v722_v4 = vmul.f32 %v1205_v63, %v720_v59 }
 0x3d7   :  { %v736_v5 = vmul.f32 %v732_v62, %v723_v1  ;;  %v735_v39 = vmul.f32 %v728_v61, %v722_v4 }
 0x3d9   :  { %v749_v6 = vadd.f32 %v745_v3, %v736_v5  ;;  %v748_v33 = vadd.f32 %v741_v2, %v735_v39 }
 0x3db   :  { %v751_v7 = vmax.f32 %v749_v6, 0.0  ;;  %v750_v32 = vmax.f32 %v748_v33, 0.0 }
 0x3dd   :  { %855 = vmatprep.mubr.f32.mxu1 %v751_v7 }
 0x3de   :  { %856 = vmatmul.mubr.f32.vlgmr.msra.gmra.mrb[4].mxu1 %v750_v32 }
 0x4b1   :  { %v959_v55 = vpop.f32.mrb[4].mxu1 }
 0x4b2   :  { %v960_v8 = vpop.f32.mrb[5].mxu1 }
 0x4b3   :  { %v961_v42 = vadd.f32 %v960_v8, %v959_v55 }
 0x4b5   :  { %v858_v9 = vadd.f32 %v961_v42, %v924_v57 }
 0x4b7   :  { %863 = vadd.xlane.f32.xlu0 %v858_v9  ;;  %v865_v25 = vmul.f32 %v858_v9, %v858_v9 }
 0x4b9   :  { %866 = vadd.xlane.f32.xlu1 %v865_v25 }
 0x544   :  { %v864_v26 = vpop.xlane.xlu0 %863 }
 0x545   :  { %v868_v10 = vmul.f32 0.0625, %v864_v26 }
 0x546   :  { %v867_v11 = vpop.xlane.xlu1 %866 }
 0x547   :  { %v870_v12 = vmul.f32 %v868_v10, %v868_v10  ;;  %v869_v31 = vmul.f32 0.0625, %v867_v11  ;;  %v875_v15 = vsub.f32 %v858_v9, %v868_v10 }
 0x549   :  { %v871_v14 = vsub.f32 %v869_v31, %v870_v12 }
 0x54b   :  { %v872_v30 = vmax.f32 %v871_v14, 0.0 }
 0x54d   :  { %v873_v0 = vadd.f32 1e-05, %v872_v30 }
 0x54f   :  { %1206 = vrsqrt.f32 %v873_v0 }
 0x559   :  { %v1207_v16 = vpop.eup %1206 }
 0x55a   :  { %v876_v18 = vmul.f32 %v1207_v16, %v875_v15 }
 0x55c   :  { %v883_v20 = vmul.f32 %v925_v17, %v876_v18 }
 0x55e   :  { %v890_v21 = vadd.f32 %v926_v19, %v883_v20 }
 0x560   :  { %1208 = vtanh.f32 %v890_v21 }
 0x56a   :  { %v1209_v22 = vpop.eup %1208 }
 0x56b   :  { %v893_v23 = vrot.slane %v1209_v22, 4 }
 0x56d   :  { %v894_v24 = vadd.f32 %v1209_v22, %v893_v23 }
 0x56f   :  { %v895_v27 = vrot.slane %v894_v24, 2 }
 0x571   :  { %v896_v28 = vadd.f32 %v895_v27, %v894_v24 }
 0x573   :  { %v897_v29 = vrot.slane %v896_v28, 1 }
 0x575   :  { %v898_v35 = vadd.f32 %v897_v29, %v896_v28 }
 0x577   :  { %v899_v36 = vadd.f32 %v898_v35, %v892_v34 }
 0x579   :  { %900 = vst [vmem:[#allocation10] sm:$0x1] %v899_v36 }
 0x580   :  { %v904_v37 = vld [vmem:[#allocation10] sm:$0x1] }
 0x581   :  { %v905_v38 = vmul.f32 0.125, %v904_v37 }
 0x583   :  { %906 = vst [vmem:[#allocation10] sm:$0x1] %v905_v38 }
 0x584   :  { %1309 = shalt.err (!%p1306_p8)
}
 0x585   :  { %s1310_s20 = scalar_lea.hbm %s1578_s13, 16 }
 0x586   :  { %p1311_p9 = scmp.ne.s32.totalorder %s1578_s13, %s1310_s20  ;;  %p1314_p10 = scmp.lt.u32.totalorder %s1310_s20, %s1578_s13 }
 0x588   :  { %p1316_p11 = pnand %p1314_p10, %p1311_p9 }
 0x58a   :  { %1319 = shalt.err (!%p1316_p11)
}
 0x58b   :  { %916 = dma.vmem_to_hbm [thread:$0]  %s914_s11, 16, %s1578_s13, [#allocation4]  }
 0x58c   :  { %1326 = dma.done.wait [#allocation4], 16  }
 0x58d   :  { %1327 = vsyncadd [#allocation4], 4294967280 }
 0x58e   :  { %920 = vsyncpa [#allocation3], 1 }
 0x58f   :  { %921 = vsyncpa [#allocation6], 1 }
 0x590   :  { %922 = vsyncpa [#allocation9], 1 }
 0x591   :  { %923 = vsyncpa [#allocation4], 1 }

</bundles_post_ra>
